<compile_context>
chip_gen: v6e
topology: v6e:2x2x1
jax: 0.10.0
libtpu: 0.0.40
codegen_flags: <defaults>
</compile_context>

<pallas_src>
import math
import numpy as np
import jax
import jax.numpy as jnp
from jax import lax
from jax.experimental import pallas as pl
from jax.experimental.pallas import tpu as pltpu

EPS = 1e-5

# Rows of the packed 1-D parameter slab (shape (12, dim)).
(R_PE_B, R_RED_B, R_RED_G, R_RED_BE, R_FILT_B, R_FILT_G, R_FILT_BE,
 R_KVE_B, R_LN_G, R_LN_B, R_KV_BV, R_PROJ_B) = range(12)

# Haar butterfly signs, indexed [subband s][y % 2][x % 2].
# Subband order along lanes is [LL | LH | HL | HH]; the same table serves the
# forward DWT and the inverse (the 2x2 Haar butterfly is its own inverse).
_HAAR_SIGN = np.array([[[1.,  1.], [ 1.,  1.]],
                       [[1.,  1.], [-1., -1.]],
                       [[1., -1.], [ 1., -1.]],
                       [[1., -1.], [-1.,  1.]]], dtype=np.float32)


# ----------------------------------------------------------------------------
# Deterministic parameter init (mirrors the torch module's parameter set)
# ----------------------------------------------------------------------------
def init_params(key, *, dim=32, channels=3, patch=4):
    patch_dim = channels * patch * patch
    c4 = dim // 4
    ks = jax.random.split(key, 8)
    p = {}
    # to_patch_embedding Linear(patch_dim, dim)
    p['pe_w'] = jax.random.normal(ks[0], (patch_dim, dim)) * 0.02
    p['pe_b'] = jnp.zeros((dim,))
    # q Linear(dim, dim) -- present in the module, but dead at these shapes
    # (kv length 1 => softmax == 1 => attention output == v); not used below.
    p['q_w'] = jax.random.normal(ks[1], (dim, dim)) * 0.02
    p['q_b'] = jnp.zeros((dim,))
    # reduce: Conv2d(dim, dim//4, 1) + BN
    p['red_w'] = jax.random.normal(ks[2], (dim, c4)) * math.sqrt(2.0 / (1 * 1 * c4))
    p['red_b'] = jnp.zeros((c4,))
    p['red_g'] = jnp.ones((c4,))
    p['red_be'] = jnp.zeros((c4,))
    # filter: Conv2d(dim, dim, 3, pad=1) + BN  (stored as im2col weight,
    # rows ordered (ky, kx, in_ch))
    p['filt_w'] = jax.random.normal(ks[3], (9 * dim, dim)) * math.sqrt(2.0 / (3 * 3 * dim))
    p['filt_b'] = jnp.zeros((dim,))
    p['filt_g'] = jnp.ones((dim,))
    p['filt_be'] = jnp.zeros((dim,))
    # kv_embed: Conv2d(dim, dim, k=2, s=2)  (rows ordered (spatial p, in_ch))
    p['kve_w'] = jax.random.normal(ks[4], (4 * dim, dim)) * math.sqrt(2.0 / (2 * 2 * dim))
    p['kve_b'] = jnp.zeros((dim,))
    # kv: LayerNorm(dim) + Linear(dim, 2*dim)
    p['kv_ln_g'] = jnp.ones((dim,))
    p['kv_ln_b'] = jnp.zeros((dim,))
    p['kv_w'] = jax.random.normal(ks[5], (dim, 2 * dim)) * 0.02
    p['kv_b'] = jnp.zeros((2 * dim,))
    # proj: Linear(dim + dim//4, dim)  (Dropout p=0 -> identity)
    p['proj_w'] = jax.random.normal(ks[6], (dim + c4, dim)) * 0.02
    p['proj_b'] = jnp.zeros((dim,))
    return p


# ----------------------------------------------------------------------------
# Host-side packing: parameters + constant spatial-mixing matrices
# ----------------------------------------------------------------------------
def prepare_kernel_inputs(params, *, batch):
    dim = params['pe_w'].shape[1]
    c4 = dim // 4
    Ha = Wa = 4                       # WSM always calls WaveAttention(H=4, W=4)
    hh, ww = Ha // 2, Wa // 2
    n_hi = batch * Ha * Wa            # token rows
    n_lo = batch * hh * ww            # DWT-domain rows

    def pad_row(v):
        v = jnp.asarray(v, jnp.float32)
        return jnp.pad(v, (0, dim - v.shape[0]))

    vecs = jnp.stack([
        pad_row(params['pe_b']),
        pad_row(params['red_b']), pad_row(params['red_g']), pad_row(params['red_be']),
        pad_row(params['filt_b']), pad_row(params['filt_g']), pad_row(params['filt_be']),
        pad_row(params['kve_b']),
        pad_row(params['kv_ln_g']), pad_row(params['kv_ln_b']),
        pad_row(params['kv_b'][dim:]),         # v-half bias (k-half is dead)
        pad_row(params['proj_b']),
    ], axis=0)                                 # (12, dim)

    # Haar DWT / IDWT as per-subband row-mixing matrices.
    dwt_m = np.zeros((4, n_lo, n_hi), np.float32)    # subband_s = dwt_m[s] @ x_red
    idwt_m = np.zeros((4, n_hi, n_lo), np.float32)   # x_idwt += idwt_m[s] @ filt_s
    for b in range(batch):
        for y in range(Ha):
            for x in range(Wa):
                r_hi = b * Ha * Wa + y * Wa + x
                r_lo = b * hh * ww + (y // 2) * ww + (x // 2)
                for s in range(4):
                    coef = 0.5 * _HAAR_SIGN[s, y % 2, x % 2]
                    dwt_m[s, r_lo, r_hi] = coef
                    idwt_m[s, r_hi, r_lo] = coef

    # 3x3 conv (pad=1) neighbour-gather, one matrix per tap.
    conv_g = np.zeros((9, n_lo, n_lo), np.float32)
    for b in range(batch):
        for yy in range(hh):
            for xx in range(ww):
                r_o = b * hh * ww + yy * ww + xx
                for ky in range(3):
                    for kx in range(3):
                        sy, sx = yy + ky - 1, xx + kx - 1
                        if 0 <= sy < hh and 0 <= sx < ww:
                            conv_g[ky * 3 + kx, r_o, b * hh * ww + sy * ww + sx] = 1.0

    # Lane-block place / split for the [LL|LH|HL|HH] channel packing.
    place_m = np.zeros((4, c4, 4 * c4), np.float32)
    for s in range(4):
        place_m[s, :, s * c4:(s + 1) * c4] = np.eye(c4, dtype=np.float32)
    split_m = np.ascontiguousarray(np.transpose(place_m, (0, 2, 1)))

    # kv_embed (2x2, stride 2): pick spatial position p of every batch's map.
    sel_m = np.zeros((4, batch, n_lo), np.float32)
    for b in range(batch):
        for p in range(4):
            sel_m[p, b, b * hh * ww + p] = 1.0

    # Degenerate length-1 attention: broadcast v over each batch's tokens.
    bcast = np.zeros((n_hi, batch), np.float32)
    for b in range(batch):
        bcast[b * Ha * Wa:(b + 1) * Ha * Wa, b] = 1.0

    return dict(
        pe_w=params['pe_w'],
        red_w=params['red_w'],
        filt_w=params['filt_w'].reshape(9, dim, dim),
        kve_w=params['kve_w'].reshape(4, dim, dim),
        kvw_v=params['kv_w'][:, dim:],
        proj_w_attn=params['proj_w'][:dim, :],
        proj_w_idwt=params['proj_w'][dim:, :],
        vecs=vecs,
        dwt_m=jnp.asarray(dwt_m), place_m=jnp.asarray(place_m),
        conv_g=jnp.asarray(conv_g), idwt_m=jnp.asarray(idwt_m),
        split_m=jnp.asarray(split_m), sel_m=jnp.asarray(sel_m),
        bcast=jnp.asarray(bcast),
    )


# ----------------------------------------------------------------------------
# WSM forward: boundary rearranges in XLA, everything else in ONE Pallas kernel
# ----------------------------------------------------------------------------
def wsm_forward(img, kp, *, patch=4):
    B, C_in, H_img, W_img = img.shape
    p1 = p2 = patch
    h, w = H_img // p1, W_img // p2
    N = h * w
    dim = kp['pe_w'].shape[1]
    c4 = dim // 4
    n_hi = B * N
    patch_dim = C_in * p1 * p2
    assert N == 16, "WSM hardcodes WaveAttention(H=4, W=4) -> 16 tokens"
    assert kp['bcast'].shape == (n_hi, B), "kernel constants built for a different batch"

    # Rearrange 'b c (h p1) (w p2) -> (b h w) (p1 p2 c)'
    xp = img.reshape(B, C_in, h, p1, w, p2).transpose(0, 2, 4, 3, 5, 1)
    xp = xp.reshape(n_hi, patch_dim)

    def kernel(xp_ref, pe_w_ref, red_w_ref, filt_w_ref, kve_w_ref, kvw_v_ref,
               proj_wa_ref, proj_wi_ref, vec_ref, dwt_ref, place_ref, g_ref,
               idwt_ref, split_ref, sel_ref, bc_ref, o_ref):

        def dot(a, b):
            return jnp.dot(a, b, preferred_element_type=jnp.float32)

        def prow(r, n):                       # one packed 1-D parameter row
            return vec_ref[r:r + 1, :n]

        def bn_relu(y, g, b):                 # BatchNorm2d (train-mode stats) + ReLU
            mu = jnp.mean(y, axis=0, keepdims=True)
            var = jnp.mean((y - mu) ** 2, axis=0, keepdims=True)   # biased var
            return jnp.maximum((y - mu) * lax.rsqrt(var + EPS) * g + b, 0.0)

        # 1) patch embedding (Linear)                                (n_hi, dim)
        x = dot(xp_ref[...], pe_w_ref[...]) + prow(R_PE_B, dim)
        # q = Linear(x) is dead work here: kv length is 1 => softmax == 1 =>
        # attention output == v exactly, so q / QK^T / softmax are skipped.

        # 2) reduce: 1x1 conv + BN + ReLU                            (n_hi, c4)
        x_red = bn_relu(dot(x, red_w_ref[...]) + prow(R_RED_B, c4),
                        prow(R_RED_G, c4), prow(R_RED_BE, c4))

        # 3) Haar DWT, subbands packed along lanes [LL|LH|HL|HH]     (n_lo, dim)
        x_dwt = dot(dot(dwt_ref[0], x_red), place_ref[0])
        for s in range(1, 4):
            x_dwt = x_dwt + dot(dot(dwt_ref[s], x_red), place_ref[s])

        # 4) filter: 3x3 conv(pad=1) + BN + ReLU; im2col folded into
        #    9 per-tap gather matmuls (no 9*dim buffer materialized)  (n_lo, dim)
        acc = dot(dot(g_ref[0], x_dwt), filt_w_ref[0])
        for k in range(1, 9):
            acc = acc + dot(dot(g_ref[k], x_dwt), filt_w_ref[k])
        x_filt = bn_relu(acc + prow(R_FILT_B, dim),
                         prow(R_FILT_G, dim), prow(R_FILT_BE, dim))

        # 5) Haar IDWT back to full-resolution tokens                (n_hi, c4)
        x_idwt = dot(idwt_ref[0], dot(x_filt, split_ref[0]))
        for s in range(1, 4):
            x_idwt = x_idwt + dot(idwt_ref[s], dot(x_filt, split_ref[s]))

        # 6) kv_embed: 2x2 stride-2 conv == flattened matmul         (B, dim)
        kv_e = dot(dot(sel_ref[0], x_filt), kve_w_ref[0])
        for p in range(1, 4):
            kv_e = kv_e + dot(dot(sel_ref[p], x_filt), kve_w_ref[p])
        kv_e = kv_e + prow(R_KVE_B, dim)

        # 7) kv: LayerNorm + Linear, only the v half matters         (B, dim)
        mu = jnp.mean(kv_e, axis=-1, keepdims=True)
        var = jnp.mean((kv_e - mu) ** 2, axis=-1, keepdims=True)
        kvn = (kv_e - mu) * lax.rsqrt(var + EPS) * prow(R_LN_G, dim) \
            + prow(R_LN_B, dim)
        v = dot(kvn, kvw_v_ref[...]) + prow(R_KV_BV, dim)

        # 8) degenerate length-1 attention == broadcast v over tokens (n_hi, dim)
        x_attn = dot(bc_ref[...], v)

        # 9) proj(cat([x_attn, x_idwt])) without materializing the concat
        o_ref[...] = (dot(x_attn, proj_wa_ref[...])
                      + dot(x_idwt, proj_wi_ref[...])
                      + prow(R_PROJ_B, dim))

    def _full_spec(a):
        nd = a.ndim
        return pl.BlockSpec(a.shape, lambda i: (0,) * nd)

    ins = [xp, kp['pe_w'], kp['red_w'], kp['filt_w'], kp['kve_w'], kp['kvw_v'],
           kp['proj_w_attn'], kp['proj_w_idwt'], kp['vecs'], kp['dwt_m'],
           kp['place_m'], kp['conv_g'], kp['idwt_m'], kp['split_m'],
           kp['sel_m'], kp['bcast']]

    out_flat = pl.pallas_call(
        kernel,
        out_shape=jax.ShapeDtypeStruct((n_hi, dim), jnp.float32),
        grid=(1,),
        in_specs=[_full_spec(a) for a in ins],
        out_specs=pl.BlockSpec((n_hi, dim), lambda i: (0, 0)),
        compiler_params=pltpu.CompilerParams(
            dimension_semantics=("arbitrary",)),
    )(*ins)

    # Rearrange 'b (h w) (p1 p2 c) -> b (h p1) (w p2) c'
    c_out = dim // (p1 * p2)
    out = out_flat.reshape(B, h, w, p1, p2, c_out).transpose(0, 1, 3, 2, 4, 5)
    return out.reshape(B, h * p1, w * p2, c_out)


if __name__ == "__main__":
    key = jax.random.PRNGKey(0)
    k_img, k_par = jax.random.split(key)
    # image_size=16, patch_size=4, channels=3, dim=32, heads=4 -> 16 tokens (H=W=4)
    img = jax.random.normal(k_img, (2, 3, 16, 16), jnp.float32)
    params = init_params(k_par, dim=32, channels=3, patch=4)
    kp = prepare_kernel_inputs(params, batch=img.shape[0])

    fwd = jax.jit(lambda a, kp_: wsm_forward(a, kp_, patch=4))
    out = jax.block_until_ready(fwd(img, kp))
    assert out.shape == (2, 16, 16, 2), out.shape
    assert out.dtype == jnp.float32
    print("KERNEL_OK")
</pallas_src>

<mosaic_0001>
module attributes {stable_mosaic.version = 11 : i64} {
  func.func @kernel(%arg0: i32, %arg1: memref<32x48xf32, #tpu.memory_space<vmem>>, %arg2: memref<48x32xf32, #tpu.memory_space<vmem>>, %arg3: memref<32x8xf32, #tpu.memory_space<vmem>>, %arg4: memref<9x32x32xf32, #tpu.memory_space<vmem>>, %arg5: memref<4x32x32xf32, #tpu.memory_space<vmem>>, %arg6: memref<32x32xf32, #tpu.memory_space<vmem>>, %arg7: memref<32x32xf32, #tpu.memory_space<vmem>>, %arg8: memref<8x32xf32, #tpu.memory_space<vmem>>, %arg9: memref<12x32xf32, #tpu.memory_space<vmem>>, %arg10: memref<4x8x32xf32, #tpu.memory_space<vmem>>, %arg11: memref<4x8x32xf32, #tpu.memory_space<vmem>>, %arg12: memref<9x8x8xf32, #tpu.memory_space<vmem>>, %arg13: memref<4x32x8xf32, #tpu.memory_space<vmem>>, %arg14: memref<4x32x8xf32, #tpu.memory_space<vmem>>, %arg15: memref<4x2x8xf32, #tpu.memory_space<vmem>>, %arg16: memref<32x2xf32, #tpu.memory_space<vmem>>, %arg17: memref<32x32xf32, #tpu.memory_space<vmem>>) attributes {dimension_semantics = [#tpu.dimension_semantics<arbitrary>], iteration_bounds = array<i64: 1>, scalar_prefetch = 0 : i64, scratch_operands = 0 : i64, tpu.core_type = #tpu.core_type<tc>, window_params = [{pipeline_mode = #tpu.pipeline_mode<synchronous>, transform_indices = @transform_0, window_bounds = array<i64: 32, 48>}, {pipeline_mode = #tpu.pipeline_mode<synchronous>, transform_indices = @transform_1, window_bounds = array<i64: 48, 32>}, {pipeline_mode = #tpu.pipeline_mode<synchronous>, transform_indices = @transform_2, window_bounds = array<i64: 32, 8>}, {pipeline_mode = #tpu.pipeline_mode<synchronous>, transform_indices = @transform_3, window_bounds = array<i64: 9, 32, 32>}, {pipeline_mode = #tpu.pipeline_mode<synchronous>, transform_indices = @transform_4, window_bounds = array<i64: 4, 32, 32>}, {pipeline_mode = #tpu.pipeline_mode<synchronous>, transform_indices = @transform_5, window_bounds = array<i64: 32, 32>}, {pipeline_mode = #tpu.pipeline_mode<synchronous>, transform_indices = @transform_6, window_bounds = array<i64: 32, 32>}, {pipeline_mode = #tpu.pipeline_mode<synchronous>, transform_indices = @transform_7, window_bounds = array<i64: 8, 32>}, {pipeline_mode = #tpu.pipeline_mode<synchronous>, transform_indices = @transform_8, window_bounds = array<i64: 12, 32>}, {pipeline_mode = #tpu.pipeline_mode<synchronous>, transform_indices = @transform_9, window_bounds = array<i64: 4, 8, 32>}, {pipeline_mode = #tpu.pipeline_mode<synchronous>, transform_indices = @transform_10, window_bounds = array<i64: 4, 8, 32>}, {pipeline_mode = #tpu.pipeline_mode<synchronous>, transform_indices = @transform_11, window_bounds = array<i64: 9, 8, 8>}, {pipeline_mode = #tpu.pipeline_mode<synchronous>, transform_indices = @transform_12, window_bounds = array<i64: 4, 32, 8>}, {pipeline_mode = #tpu.pipeline_mode<synchronous>, transform_indices = @transform_13, window_bounds = array<i64: 4, 32, 8>}, {pipeline_mode = #tpu.pipeline_mode<synchronous>, transform_indices = @transform_14, window_bounds = array<i64: 4, 2, 8>}, {pipeline_mode = #tpu.pipeline_mode<synchronous>, transform_indices = @transform_15, window_bounds = array<i64: 32, 2>}, {pipeline_mode = #tpu.pipeline_mode<synchronous>, transform_indices = @transform_16, window_bounds = array<i64: 32, 32>}]} {
    %c0 = arith.constant 0 : index
    %c0_0 = arith.constant 0 : index
    %0 = vector.load %arg1[%c0, %c0_0] : memref<32x48xf32, #tpu.memory_space<vmem>>, vector<32x48xf32>
    %c0_1 = arith.constant 0 : index
    %c0_2 = arith.constant 0 : index
    %1 = vector.load %arg2[%c0_1, %c0_2] : memref<48x32xf32, #tpu.memory_space<vmem>>, vector<48x32xf32>
    %cst = arith.constant dense<0.000000e+00> : vector<32x32xf32>
    %2 = tpu.matmul %0, %1, %cst {dimension_numbers = #tpu.dot_dimension_numbers<[1], [0], [0], [1], [0, 0, 1, 1], [], []>} : vector<32x48xf32>, vector<48x32xf32>, vector<32x32xf32> -> vector<32x32xf32>
    %c0_3 = arith.constant 0 : index
    %c0_4 = arith.constant 0 : index
    %3 = vector.load %arg9[%c0_3, %c0_4] : memref<12x32xf32, #tpu.memory_space<vmem>>, vector<1x32xf32>
    %4 = vector.broadcast %3 : vector<1x32xf32> to vector<32x32xf32>
    %5 = arith.addf %2, %4 : vector<32x32xf32>
    %c0_5 = arith.constant 0 : index
    %c0_6 = arith.constant 0 : index
    %6 = vector.load %arg3[%c0_5, %c0_6] : memref<32x8xf32, #tpu.memory_space<vmem>>, vector<32x8xf32>
    %cst_7 = arith.constant dense<0.000000e+00> : vector<32x8xf32>
    %7 = tpu.matmul %5, %6, %cst_7 {dimension_numbers = #tpu.dot_dimension_numbers<[1], [0], [0], [1], [0, 0, 1, 1], [], []>} : vector<32x32xf32>, vector<32x8xf32>, vector<32x8xf32> -> vector<32x8xf32>
    %c1 = arith.constant 1 : index
    %c0_8 = arith.constant 0 : index
    %8 = vector.load %arg9[%c1, %c0_8] : memref<12x32xf32, #tpu.memory_space<vmem>>, vector<1x8xf32>
    %9 = vector.broadcast %8 : vector<1x8xf32> to vector<32x8xf32>
    %10 = arith.addf %7, %9 : vector<32x8xf32>
    %c2 = arith.constant 2 : index
    %c0_9 = arith.constant 0 : index
    %11 = vector.load %arg9[%c2, %c0_9] : memref<12x32xf32, #tpu.memory_space<vmem>>, vector<1x8xf32>
    %c3 = arith.constant 3 : index
    %c0_10 = arith.constant 0 : index
    %12 = vector.load %arg9[%c3, %c0_10] : memref<12x32xf32, #tpu.memory_space<vmem>>, vector<1x8xf32>
    %cst_11 = arith.constant dense<0.000000e+00> : vector<8xf32>
    %13 = vector.multi_reduction <add>, %10, %cst_11 [0] : vector<32x8xf32> to vector<8xf32>
    %14 = vector.shape_cast %13 : vector<8xf32> to vector<1x8xf32>
    %cst_12 = arith.constant 3.200000e+01 : f32
    %15 = vector.broadcast %cst_12 : f32 to vector<1x8xf32>
    %16 = arith.divf %14, %15 : vector<1x8xf32>
    %17 = vector.broadcast %16 : vector<1x8xf32> to vector<32x8xf32>
    %18 = arith.subf %10, %17 : vector<32x8xf32>
    %19 = arith.mulf %18, %18 : vector<32x8xf32>
    %cst_13 = arith.constant dense<0.000000e+00> : vector<8xf32>
    %20 = vector.multi_reduction <add>, %19, %cst_13 [0] : vector<32x8xf32> to vector<8xf32>
    %21 = vector.shape_cast %20 : vector<8xf32> to vector<1x8xf32>
    %cst_14 = arith.constant 3.200000e+01 : f32
    %22 = vector.broadcast %cst_14 : f32 to vector<1x8xf32>
    %23 = arith.divf %21, %22 : vector<1x8xf32>
    %24 = vector.broadcast %16 : vector<1x8xf32> to vector<32x8xf32>
    %25 = arith.subf %10, %24 : vector<32x8xf32>
    %cst_15 = arith.constant 9.99999974E-6 : f32
    %26 = vector.broadcast %cst_15 : f32 to vector<1x8xf32>
    %27 = arith.addf %23, %26 : vector<1x8xf32>
    %28 = math.rsqrt %27 : vector<1x8xf32>
    %29 = vector.broadcast %28 : vector<1x8xf32> to vector<32x8xf32>
    %30 = arith.mulf %25, %29 : vector<32x8xf32>
    %31 = vector.broadcast %11 : vector<1x8xf32> to vector<32x8xf32>
    %32 = arith.mulf %30, %31 : vector<32x8xf32>
    %33 = vector.broadcast %12 : vector<1x8xf32> to vector<32x8xf32>
    %34 = arith.addf %32, %33 : vector<32x8xf32>
    %cst_16 = arith.constant 0.000000e+00 : f32
    %35 = vector.broadcast %cst_16 : f32 to vector<32x8xf32>
    %36 = arith.maximumf %34, %35 : vector<32x8xf32>
    %c0_17 = arith.constant 0 : index
    %c0_18 = arith.constant 0 : index
    %c0_19 = arith.constant 0 : index
    %37 = vector.load %arg10[%c0_17, %c0_18, %c0_19] : memref<4x8x32xf32, #tpu.memory_space<vmem>>, vector<1x8x32xf32>
    %38 = vector.shape_cast %37 : vector<1x8x32xf32> to vector<8x32xf32>
    %cst_20 = arith.constant dense<0.000000e+00> : vector<8x8xf32>
    %39 = tpu.matmul %38, %36, %cst_20 {dimension_numbers = #tpu.dot_dimension_numbers<[1], [0], [0], [1], [0, 0, 1, 1], [], []>} : vector<8x32xf32>, vector<32x8xf32>, vector<8x8xf32> -> vector<8x8xf32>
    %c0_21 = arith.constant 0 : index
    %c0_22 = arith.constant 0 : index
    %c0_23 = arith.constant 0 : index
    %40 = vector.load %arg11[%c0_21, %c0_22, %c0_23] : memref<4x8x32xf32, #tpu.memory_space<vmem>>, vector<1x8x32xf32>
    %41 = vector.shape_cast %40 : vector<1x8x32xf32> to vector<8x32xf32>
    %cst_24 = arith.constant dense<0.000000e+00> : vector<8x32xf32>
    %42 = tpu.matmul %39, %41, %cst_24 {dimension_numbers = #tpu.dot_dimension_numbers<[1], [0], [0], [1], [0, 0, 1, 1], [], []>} : vector<8x8xf32>, vector<8x32xf32>, vector<8x32xf32> -> vector<8x32xf32>
    %c1_25 = arith.constant 1 : index
    %c0_26 = arith.constant 0 : index
    %c0_27 = arith.constant 0 : index
    %43 = vector.load %arg10[%c1_25, %c0_26, %c0_27] : memref<4x8x32xf32, #tpu.memory_space<vmem>>, vector<1x8x32xf32>
    %44 = vector.shape_cast %43 : vector<1x8x32xf32> to vector<8x32xf32>
    %cst_28 = arith.constant dense<0.000000e+00> : vector<8x8xf32>
    %45 = tpu.matmul %44, %36, %cst_28 {dimension_numbers = #tpu.dot_dimension_numbers<[1], [0], [0], [1], [0, 0, 1, 1], [], []>} : vector<8x32xf32>, vector<32x8xf32>, vector<8x8xf32> -> vector<8x8xf32>
    %c1_29 = arith.constant 1 : index
    %c0_30 = arith.constant 0 : index
    %c0_31 = arith.constant 0 : index
    %46 = vector.load %arg11[%c1_29, %c0_30, %c0_31] : memref<4x8x32xf32, #tpu.memory_space<vmem>>, vector<1x8x32xf32>
    %47 = vector.shape_cast %46 : vector<1x8x32xf32> to vector<8x32xf32>
    %cst_32 = arith.constant dense<0.000000e+00> : vector<8x32xf32>
    %48 = tpu.matmul %45, %47, %cst_32 {dimension_numbers = #tpu.dot_dimension_numbers<[1], [0], [0], [1], [0, 0, 1, 1], [], []>} : vector<8x8xf32>, vector<8x32xf32>, vector<8x32xf32> -> vector<8x32xf32>
    %49 = arith.addf %42, %48 : vector<8x32xf32>
    %c2_33 = arith.constant 2 : index
    %c0_34 = arith.constant 0 : index
    %c0_35 = arith.constant 0 : index
    %50 = vector.load %arg10[%c2_33, %c0_34, %c0_35] : memref<4x8x32xf32, #tpu.memory_space<vmem>>, vector<1x8x32xf32>
    %51 = vector.shape_cast %50 : vector<1x8x32xf32> to vector<8x32xf32>
    %cst_36 = arith.constant dense<0.000000e+00> : vector<8x8xf32>
    %52 = tpu.matmul %51, %36, %cst_36 {dimension_numbers = #tpu.dot_dimension_numbers<[1], [0], [0], [1], [0, 0, 1, 1], [], []>} : vector<8x32xf32>, vector<32x8xf32>, vector<8x8xf32> -> vector<8x8xf32>
    %c2_37 = arith.constant 2 : index
    %c0_38 = arith.constant 0 : index
    %c0_39 = arith.constant 0 : index
    %53 = vector.load %arg11[%c2_37, %c0_38, %c0_39] : memref<4x8x32xf32, #tpu.memory_space<vmem>>, vector<1x8x32xf32>
    %54 = vector.shape_cast %53 : vector<1x8x32xf32> to vector<8x32xf32>
    %cst_40 = arith.constant dense<0.000000e+00> : vector<8x32xf32>
    %55 = tpu.matmul %52, %54, %cst_40 {dimension_numbers = #tpu.dot_dimension_numbers<[1], [0], [0], [1], [0, 0, 1, 1], [], []>} : vector<8x8xf32>, vector<8x32xf32>, vector<8x32xf32> -> vector<8x32xf32>
    %56 = arith.addf %49, %55 : vector<8x32xf32>
    %c3_41 = arith.constant 3 : index
    %c0_42 = arith.constant 0 : index
    %c0_43 = arith.constant 0 : index
    %57 = vector.load %arg10[%c3_41, %c0_42, %c0_43] : memref<4x8x32xf32, #tpu.memory_space<vmem>>, vector<1x8x32xf32>
    %58 = vector.shape_cast %57 : vector<1x8x32xf32> to vector<8x32xf32>
    %cst_44 = arith.constant dense<0.000000e+00> : vector<8x8xf32>
    %59 = tpu.matmul %58, %36, %cst_44 {dimension_numbers = #tpu.dot_dimension_numbers<[1], [0], [0], [1], [0, 0, 1, 1], [], []>} : vector<8x32xf32>, vector<32x8xf32>, vector<8x8xf32> -> vector<8x8xf32>
    %c3_45 = arith.constant 3 : index
    %c0_46 = arith.constant 0 : index
    %c0_47 = arith.constant 0 : index
    %60 = vector.load %arg11[%c3_45, %c0_46, %c0_47] : memref<4x8x32xf32, #tpu.memory_space<vmem>>, vector<1x8x32xf32>
    %61 = vector.shape_cast %60 : vector<1x8x32xf32> to vector<8x32xf32>
    %cst_48 = arith.constant dense<0.000000e+00> : vector<8x32xf32>
    %62 = tpu.matmul %59, %61, %cst_48 {dimension_numbers = #tpu.dot_dimension_numbers<[1], [0], [0], [1], [0, 0, 1, 1], [], []>} : vector<8x8xf32>, vector<8x32xf32>, vector<8x32xf32> -> vector<8x32xf32>
    %63 = arith.addf %56, %62 : vector<8x32xf32>
    %c0_49 = arith.constant 0 : index
    %c0_50 = arith.constant 0 : index
    %c0_51 = arith.constant 0 : index
    %64 = vector.load %arg12[%c0_49, %c0_50, %c0_51] : memref<9x8x8xf32, #tpu.memory_space<vmem>>, vector<1x8x8xf32>
    %65 = vector.shape_cast %64 : vector<1x8x8xf32> to vector<8x8xf32>
    %cst_52 = arith.constant dense<0.000000e+00> : vector<8x32xf32>
    %66 = tpu.matmul %65, %63, %cst_52 {dimension_numbers = #tpu.dot_dimension_numbers<[1], [0], [0], [1], [0, 0, 1, 1], [], []>} : vector<8x8xf32>, vector<8x32xf32>, vector<8x32xf32> -> vector<8x32xf32>
    %c0_53 = arith.constant 0 : index
    %c0_54 = arith.constant 0 : index
    %c0_55 = arith.constant 0 : index
    %67 = vector.load %arg4[%c0_53, %c0_54, %c0_55] : memref<9x32x32xf32, #tpu.memory_space<vmem>>, vector<1x32x32xf32>
    %68 = vector.shape_cast %67 : vector<1x32x32xf32> to vector<32x32xf32>
    %cst_56 = arith.constant dense<0.000000e+00> : vector<8x32xf32>
    %69 = tpu.matmul %66, %68, %cst_56 {dimension_numbers = #tpu.dot_dimension_numbers<[1], [0], [0], [1], [0, 0, 1, 1], [], []>} : vector<8x32xf32>, vector<32x32xf32>, vector<8x32xf32> -> vector<8x32xf32>
    %c1_57 = arith.constant 1 : index
    %c0_58 = arith.constant 0 : index
    %c0_59 = arith.constant 0 : index
    %70 = vector.load %arg12[%c1_57, %c0_58, %c0_59] : memref<9x8x8xf32, #tpu.memory_space<vmem>>, vector<1x8x8xf32>
    %71 = vector.shape_cast %70 : vector<1x8x8xf32> to vector<8x8xf32>
    %cst_60 = arith.constant dense<0.000000e+00> : vector<8x32xf32>
    %72 = tpu.matmul %71, %63, %cst_60 {dimension_numbers = #tpu.dot_dimension_numbers<[1], [0], [0], [1], [0, 0, 1, 1], [], []>} : vector<8x8xf32>, vector<8x32xf32>, vector<8x32xf32> -> vector<8x32xf32>
    %c1_61 = arith.constant 1 : index
    %c0_62 = arith.constant 0 : index
    %c0_63 = arith.constant 0 : index
    %73 = vector.load %arg4[%c1_61, %c0_62, %c0_63] : memref<9x32x32xf32, #tpu.memory_space<vmem>>, vector<1x32x32xf32>
    %74 = vector.shape_cast %73 : vector<1x32x32xf32> to vector<32x32xf32>
    %cst_64 = arith.constant dense<0.000000e+00> : vector<8x32xf32>
    %75 = tpu.matmul %72, %74, %cst_64 {dimension_numbers = #tpu.dot_dimension_numbers<[1], [0], [0], [1], [0, 0, 1, 1], [], []>} : vector<8x32xf32>, vector<32x32xf32>, vector<8x32xf32> -> vector<8x32xf32>
    %76 = arith.addf %69, %75 : vector<8x32xf32>
    %c2_65 = arith.constant 2 : index
    %c0_66 = arith.constant 0 : index
    %c0_67 = arith.constant 0 : index
    %77 = vector.load %arg12[%c2_65, %c0_66, %c0_67] : memref<9x8x8xf32, #tpu.memory_space<vmem>>, vector<1x8x8xf32>
    %78 = vector.shape_cast %77 : vector<1x8x8xf32> to vector<8x8xf32>
    %cst_68 = arith.constant dense<0.000000e+00> : vector<8x32xf32>
    %79 = tpu.matmul %78, %63, %cst_68 {dimension_numbers = #tpu.dot_dimension_numbers<[1], [0], [0], [1], [0, 0, 1, 1], [], []>} : vector<8x8xf32>, vector<8x32xf32>, vector<8x32xf32> -> vector<8x32xf32>
    %c2_69 = arith.constant 2 : index
    %c0_70 = arith.constant 0 : index
    %c0_71 = arith.constant 0 : index
    %80 = vector.load %arg4[%c2_69, %c0_70, %c0_71] : memref<9x32x32xf32, #tpu.memory_space<vmem>>, vector<1x32x32xf32>
    %81 = vector.shape_cast %80 : vector<1x32x32xf32> to vector<32x32xf32>
    %cst_72 = arith.constant dense<0.000000e+00> : vector<8x32xf32>
    %82 = tpu.matmul %79, %81, %cst_72 {dimension_numbers = #tpu.dot_dimension_numbers<[1], [0], [0], [1], [0, 0, 1, 1], [], []>} : vector<8x32xf32>, vector<32x32xf32>, vector<8x32xf32> -> vector<8x32xf32>
    %83 = arith.addf %76, %82 : vector<8x32xf32>
    %c3_73 = arith.constant 3 : index
    %c0_74 = arith.constant 0 : index
    %c0_75 = arith.constant 0 : index
    %84 = vector.load %arg12[%c3_73, %c0_74, %c0_75] : memref<9x8x8xf32, #tpu.memory_space<vmem>>, vector<1x8x8xf32>
    %85 = vector.shape_cast %84 : vector<1x8x8xf32> to vector<8x8xf32>
    %cst_76 = arith.constant dense<0.000000e+00> : vector<8x32xf32>
    %86 = tpu.matmul %85, %63, %cst_76 {dimension_numbers = #tpu.dot_dimension_numbers<[1], [0], [0], [1], [0, 0, 1, 1], [], []>} : vector<8x8xf32>, vector<8x32xf32>, vector<8x32xf32> -> vector<8x32xf32>
    %c3_77 = arith.constant 3 : index
    %c0_78 = arith.constant 0 : index
    %c0_79 = arith.constant 0 : index
    %87 = vector.load %arg4[%c3_77, %c0_78, %c0_79] : memref<9x32x32xf32, #tpu.memory_space<vmem>>, vector<1x32x32xf32>
    %88 = vector.shape_cast %87 : vector<1x32x32xf32> to vector<32x32xf32>
    %cst_80 = arith.constant dense<0.000000e+00> : vector<8x32xf32>
    %89 = tpu.matmul %86, %88, %cst_80 {dimension_numbers = #tpu.dot_dimension_numbers<[1], [0], [0], [1], [0, 0, 1, 1], [], []>} : vector<8x32xf32>, vector<32x32xf32>, vector<8x32xf32> -> vector<8x32xf32>
    %90 = arith.addf %83, %89 : vector<8x32xf32>
    %c4 = arith.constant 4 : index
    %c0_81 = arith.constant 0 : index
    %c0_82 = arith.constant 0 : index
    %91 = vector.load %arg12[%c4, %c0_81, %c0_82] : memref<9x8x8xf32, #tpu.memory_space<vmem>>, vector<1x8x8xf32>
    %92 = vector.shape_cast %91 : vector<1x8x8xf32> to vector<8x8xf32>
    %cst_83 = arith.constant dense<0.000000e+00> : vector<8x32xf32>
    %93 = tpu.matmul %92, %63, %cst_83 {dimension_numbers = #tpu.dot_dimension_numbers<[1], [0], [0], [1], [0, 0, 1, 1], [], []>} : vector<8x8xf32>, vector<8x32xf32>, vector<8x32xf32> -> vector<8x32xf32>
    %c4_84 = arith.constant 4 : index
    %c0_85 = arith.constant 0 : index
    %c0_86 = arith.constant 0 : index
    %94 = vector.load %arg4[%c4_84, %c0_85, %c0_86] : memref<9x32x32xf32, #tpu.memory_space<vmem>>, vector<1x32x32xf32>
    %95 = vector.shape_cast %94 : vector<1x32x32xf32> to vector<32x32xf32>
    %cst_87 = arith.constant dense<0.000000e+00> : vector<8x32xf32>
    %96 = tpu.matmul %93, %95, %cst_87 {dimension_numbers = #tpu.dot_dimension_numbers<[1], [0], [0], [1], [0, 0, 1, 1], [], []>} : vector<8x32xf32>, vector<32x32xf32>, vector<8x32xf32> -> vector<8x32xf32>
    %97 = arith.addf %90, %96 : vector<8x32xf32>
    %c5 = arith.constant 5 : index
    %c0_88 = arith.constant 0 : index
    %c0_89 = arith.constant 0 : index
    %98 = vector.load %arg12[%c5, %c0_88, %c0_89] : memref<9x8x8xf32, #tpu.memory_space<vmem>>, vector<1x8x8xf32>
    %99 = vector.shape_cast %98 : vector<1x8x8xf32> to vector<8x8xf32>
    %cst_90 = arith.constant dense<0.000000e+00> : vector<8x32xf32>
    %100 = tpu.matmul %99, %63, %cst_90 {dimension_numbers = #tpu.dot_dimension_numbers<[1], [0], [0], [1], [0, 0, 1, 1], [], []>} : vector<8x8xf32>, vector<8x32xf32>, vector<8x32xf32> -> vector<8x32xf32>
    %c5_91 = arith.constant 5 : index
    %c0_92 = arith.constant 0 : index
    %c0_93 = arith.constant 0 : index
    %101 = vector.load %arg4[%c5_91, %c0_92, %c0_93] : memref<9x32x32xf32, #tpu.memory_space<vmem>>, vector<1x32x32xf32>
    %102 = vector.shape_cast %101 : vector<1x32x32xf32> to vector<32x32xf32>
    %cst_94 = arith.constant dense<0.000000e+00> : vector<8x32xf32>
    %103 = tpu.matmul %100, %102, %cst_94 {dimension_numbers = #tpu.dot_dimension_numbers<[1], [0], [0], [1], [0, 0, 1, 1], [], []>} : vector<8x32xf32>, vector<32x32xf32>, vector<8x32xf32> -> vector<8x32xf32>
    %104 = arith.addf %97, %103 : vector<8x32xf32>
    %c6 = arith.constant 6 : index
    %c0_95 = arith.constant 0 : index
    %c0_96 = arith.constant 0 : index
    %105 = vector.load %arg12[%c6, %c0_95, %c0_96] : memref<9x8x8xf32, #tpu.memory_space<vmem>>, vector<1x8x8xf32>
    %106 = vector.shape_cast %105 : vector<1x8x8xf32> to vector<8x8xf32>
    %cst_97 = arith.constant dense<0.000000e+00> : vector<8x32xf32>
    %107 = tpu.matmul %106, %63, %cst_97 {dimension_numbers = #tpu.dot_dimension_numbers<[1], [0], [0], [1], [0, 0, 1, 1], [], []>} : vector<8x8xf32>, vector<8x32xf32>, vector<8x32xf32> -> vector<8x32xf32>
    %c6_98 = arith.constant 6 : index
    %c0_99 = arith.constant 0 : index
    %c0_100 = arith.constant 0 : index
    %108 = vector.load %arg4[%c6_98, %c0_99, %c0_100] : memref<9x32x32xf32, #tpu.memory_space<vmem>>, vector<1x32x32xf32>
    %109 = vector.shape_cast %108 : vector<1x32x32xf32> to vector<32x32xf32>
    %cst_101 = arith.constant dense<0.000000e+00> : vector<8x32xf32>
    %110 = tpu.matmul %107, %109, %cst_101 {dimension_numbers = #tpu.dot_dimension_numbers<[1], [0], [0], [1], [0, 0, 1, 1], [], []>} : vector<8x32xf32>, vector<32x32xf32>, vector<8x32xf32> -> vector<8x32xf32>
    %111 = arith.addf %104, %110 : vector<8x32xf32>
    %c7 = arith.constant 7 : index
    %c0_102 = arith.constant 0 : index
    %c0_103 = arith.constant 0 : index
    %112 = vector.load %arg12[%c7, %c0_102, %c0_103] : memref<9x8x8xf32, #tpu.memory_space<vmem>>, vector<1x8x8xf32>
    %113 = vector.shape_cast %112 : vector<1x8x8xf32> to vector<8x8xf32>
    %cst_104 = arith.constant dense<0.000000e+00> : vector<8x32xf32>
    %114 = tpu.matmul %113, %63, %cst_104 {dimension_numbers = #tpu.dot_dimension_numbers<[1], [0], [0], [1], [0, 0, 1, 1], [], []>} : vector<8x8xf32>, vector<8x32xf32>, vector<8x32xf32> -> vector<8x32xf32>
    %c7_105 = arith.constant 7 : index
    %c0_106 = arith.constant 0 : index
    %c0_107 = arith.constant 0 : index
    %115 = vector.load %arg4[%c7_105, %c0_106, %c0_107] : memref<9x32x32xf32, #tpu.memory_space<vmem>>, vector<1x32x32xf32>
    %116 = vector.shape_cast %115 : vector<1x32x32xf32> to vector<32x32xf32>
    %cst_108 = arith.constant dense<0.000000e+00> : vector<8x32xf32>
    %117 = tpu.matmul %114, %116, %cst_108 {dimension_numbers = #tpu.dot_dimension_numbers<[1], [0], [0], [1], [0, 0, 1, 1], [], []>} : vector<8x32xf32>, vector<32x32xf32>, vector<8x32xf32> -> vector<8x32xf32>
    %118 = arith.addf %111, %117 : vector<8x32xf32>
    %c8 = arith.constant 8 : index
    %c0_109 = arith.constant 0 : index
    %c0_110 = arith.constant 0 : index
    %119 = vector.load %arg12[%c8, %c0_109, %c0_110] : memref<9x8x8xf32, #tpu.memory_space<vmem>>, vector<1x8x8xf32>
    %120 = vector.shape_cast %119 : vector<1x8x8xf32> to vector<8x8xf32>
    %cst_111 = arith.constant dense<0.000000e+00> : vector<8x32xf32>
    %121 = tpu.matmul %120, %63, %cst_111 {dimension_numbers = #tpu.dot_dimension_numbers<[1], [0], [0], [1], [0, 0, 1, 1], [], []>} : vector<8x8xf32>, vector<8x32xf32>, vector<8x32xf32> -> vector<8x32xf32>
    %c8_112 = arith.constant 8 : index
    %c0_113 = arith.constant 0 : index
    %c0_114 = arith.constant 0 : index
    %122 = vector.load %arg4[%c8_112, %c0_113, %c0_114] : memref<9x32x32xf32, #tpu.memory_space<vmem>>, vector<1x32x32xf32>
    %123 = vector.shape_cast %122 : vector<1x32x32xf32> to vector<32x32xf32>
    %cst_115 = arith.constant dense<0.000000e+00> : vector<8x32xf32>
    %124 = tpu.matmul %121, %123, %cst_115 {dimension_numbers = #tpu.dot_dimension_numbers<[1], [0], [0], [1], [0, 0, 1, 1], [], []>} : vector<8x32xf32>, vector<32x32xf32>, vector<8x32xf32> -> vector<8x32xf32>
    %125 = arith.addf %118, %124 : vector<8x32xf32>
    %c4_116 = arith.constant 4 : index
    %c0_117 = arith.constant 0 : index
    %126 = vector.load %arg9[%c4_116, %c0_117] : memref<12x32xf32, #tpu.memory_space<vmem>>, vector<1x32xf32>
    %127 = vector.broadcast %126 : vector<1x32xf32> to vector<8x32xf32>
    %128 = arith.addf %125, %127 : vector<8x32xf32>
    %c5_118 = arith.constant 5 : index
    %c0_119 = arith.constant 0 : index
    %129 = vector.load %arg9[%c5_118, %c0_119] : memref<12x32xf32, #tpu.memory_space<vmem>>, vector<1x32xf32>
    %c6_120 = arith.constant 6 : index
    %c0_121 = arith.constant 0 : index
    %130 = vector.load %arg9[%c6_120, %c0_121] : memref<12x32xf32, #tpu.memory_space<vmem>>, vector<1x32xf32>
    %cst_122 = arith.constant dense<0.000000e+00> : vector<32xf32>
    %131 = vector.multi_reduction <add>, %128, %cst_122 [0] : vector<8x32xf32> to vector<32xf32>
    %132 = vector.shape_cast %131 : vector<32xf32> to vector<1x32xf32>
    %cst_123 = arith.constant 8.000000e+00 : f32
    %133 = vector.broadcast %cst_123 : f32 to vector<1x32xf32>
    %134 = arith.divf %132, %133 : vector<1x32xf32>
    %135 = vector.broadcast %134 : vector<1x32xf32> to vector<8x32xf32>
    %136 = arith.subf %128, %135 : vector<8x32xf32>
    %137 = arith.mulf %136, %136 : vector<8x32xf32>
    %cst_124 = arith.constant dense<0.000000e+00> : vector<32xf32>
    %138 = vector.multi_reduction <add>, %137, %cst_124 [0] : vector<8x32xf32> to vector<32xf32>
    %139 = vector.shape_cast %138 : vector<32xf32> to vector<1x32xf32>
    %cst_125 = arith.constant 8.000000e+00 : f32
    %140 = vector.broadcast %cst_125 : f32 to vector<1x32xf32>
    %141 = arith.divf %139, %140 : vector<1x32xf32>
    %142 = vector.broadcast %134 : vector<1x32xf32> to vector<8x32xf32>
    %143 = arith.subf %128, %142 : vector<8x32xf32>
    %cst_126 = arith.constant 9.99999974E-6 : f32
    %144 = vector.broadcast %cst_126 : f32 to vector<1x32xf32>
    %145 = arith.addf %141, %144 : vector<1x32xf32>
    %146 = math.rsqrt %145 : vector<1x32xf32>
    %147 = vector.broadcast %146 : vector<1x32xf32> to vector<8x32xf32>
    %148 = arith.mulf %143, %147 : vector<8x32xf32>
    %149 = vector.broadcast %129 : vector<1x32xf32> to vector<8x32xf32>
    %150 = arith.mulf %148, %149 : vector<8x32xf32>
    %151 = vector.broadcast %130 : vector<1x32xf32> to vector<8x32xf32>
    %152 = arith.addf %150, %151 : vector<8x32xf32>
    %cst_127 = arith.constant 0.000000e+00 : f32
    %153 = vector.broadcast %cst_127 : f32 to vector<8x32xf32>
    %154 = arith.maximumf %152, %153 : vector<8x32xf32>
    %c0_128 = arith.constant 0 : index
    %c0_129 = arith.constant 0 : index
    %c0_130 = arith.constant 0 : index
    %155 = vector.load %arg13[%c0_128, %c0_129, %c0_130] : memref<4x32x8xf32, #tpu.memory_space<vmem>>, vector<1x32x8xf32>
    %156 = vector.shape_cast %155 : vector<1x32x8xf32> to vector<32x8xf32>
    %c0_131 = arith.constant 0 : index
    %c0_132 = arith.constant 0 : index
    %c0_133 = arith.constant 0 : index
    %157 = vector.load %arg14[%c0_131, %c0_132, %c0_133] : memref<4x32x8xf32, #tpu.memory_space<vmem>>, vector<1x32x8xf32>
    %158 = vector.shape_cast %157 : vector<1x32x8xf32> to vector<32x8xf32>
    %cst_134 = arith.constant dense<0.000000e+00> : vector<8x8xf32>
    %159 = tpu.matmul %154, %158, %cst_134 {dimension_numbers = #tpu.dot_dimension_numbers<[1], [0], [0], [1], [0, 0, 1, 1], [], []>} : vector<8x32xf32>, vector<32x8xf32>, vector<8x8xf32> -> vector<8x8xf32>
    %cst_135 = arith.constant dense<0.000000e+00> : vector<32x8xf32>
    %160 = tpu.matmul %156, %159, %cst_135 {dimension_numbers = #tpu.dot_dimension_numbers<[1], [0], [0], [1], [0, 0, 1, 1], [], []>} : vector<32x8xf32>, vector<8x8xf32>, vector<32x8xf32> -> vector<32x8xf32>
    %c1_136 = arith.constant 1 : index
    %c0_137 = arith.constant 0 : index
    %c0_138 = arith.constant 0 : index
    %161 = vector.load %arg13[%c1_136, %c0_137, %c0_138] : memref<4x32x8xf32, #tpu.memory_space<vmem>>, vector<1x32x8xf32>
    %162 = vector.shape_cast %161 : vector<1x32x8xf32> to vector<32x8xf32>
    %c1_139 = arith.constant 1 : index
    %c0_140 = arith.constant 0 : index
    %c0_141 = arith.constant 0 : index
    %163 = vector.load %arg14[%c1_139, %c0_140, %c0_141] : memref<4x32x8xf32, #tpu.memory_space<vmem>>, vector<1x32x8xf32>
    %164 = vector.shape_cast %163 : vector<1x32x8xf32> to vector<32x8xf32>
    %cst_142 = arith.constant dense<0.000000e+00> : vector<8x8xf32>
    %165 = tpu.matmul %154, %164, %cst_142 {dimension_numbers = #tpu.dot_dimension_numbers<[1], [0], [0], [1], [0, 0, 1, 1], [], []>} : vector<8x32xf32>, vector<32x8xf32>, vector<8x8xf32> -> vector<8x8xf32>
    %cst_143 = arith.constant dense<0.000000e+00> : vector<32x8xf32>
    %166 = tpu.matmul %162, %165, %cst_143 {dimension_numbers = #tpu.dot_dimension_numbers<[1], [0], [0], [1], [0, 0, 1, 1], [], []>} : vector<32x8xf32>, vector<8x8xf32>, vector<32x8xf32> -> vector<32x8xf32>
    %167 = arith.addf %160, %166 : vector<32x8xf32>
    %c2_144 = arith.constant 2 : index
    %c0_145 = arith.constant 0 : index
    %c0_146 = arith.constant 0 : index
    %168 = vector.load %arg13[%c2_144, %c0_145, %c0_146] : memref<4x32x8xf32, #tpu.memory_space<vmem>>, vector<1x32x8xf32>
    %169 = vector.shape_cast %168 : vector<1x32x8xf32> to vector<32x8xf32>
    %c2_147 = arith.constant 2 : index
    %c0_148 = arith.constant 0 : index
    %c0_149 = arith.constant 0 : index
    %170 = vector.load %arg14[%c2_147, %c0_148, %c0_149] : memref<4x32x8xf32, #tpu.memory_space<vmem>>, vector<1x32x8xf32>
    %171 = vector.shape_cast %170 : vector<1x32x8xf32> to vector<32x8xf32>
    %cst_150 = arith.constant dense<0.000000e+00> : vector<8x8xf32>
    %172 = tpu.matmul %154, %171, %cst_150 {dimension_numbers = #tpu.dot_dimension_numbers<[1], [0], [0], [1], [0, 0, 1, 1], [], []>} : vector<8x32xf32>, vector<32x8xf32>, vector<8x8xf32> -> vector<8x8xf32>
    %cst_151 = arith.constant dense<0.000000e+00> : vector<32x8xf32>
    %173 = tpu.matmul %169, %172, %cst_151 {dimension_numbers = #tpu.dot_dimension_numbers<[1], [0], [0], [1], [0, 0, 1, 1], [], []>} : vector<32x8xf32>, vector<8x8xf32>, vector<32x8xf32> -> vector<32x8xf32>
    %174 = arith.addf %167, %173 : vector<32x8xf32>
    %c3_152 = arith.constant 3 : index
    %c0_153 = arith.constant 0 : index
    %c0_154 = arith.constant 0 : index
    %175 = vector.load %arg13[%c3_152, %c0_153, %c0_154] : memref<4x32x8xf32, #tpu.memory_space<vmem>>, vector<1x32x8xf32>
    %176 = vector.shape_cast %175 : vector<1x32x8xf32> to vector<32x8xf32>
    %c3_155 = arith.constant 3 : index
    %c0_156 = arith.constant 0 : index
    %c0_157 = arith.constant 0 : index
    %177 = vector.load %arg14[%c3_155, %c0_156, %c0_157] : memref<4x32x8xf32, #tpu.memory_space<vmem>>, vector<1x32x8xf32>
    %178 = vector.shape_cast %177 : vector<1x32x8xf32> to vector<32x8xf32>
    %cst_158 = arith.constant dense<0.000000e+00> : vector<8x8xf32>
    %179 = tpu.matmul %154, %178, %cst_158 {dimension_numbers = #tpu.dot_dimension_numbers<[1], [0], [0], [1], [0, 0, 1, 1], [], []>} : vector<8x32xf32>, vector<32x8xf32>, vector<8x8xf32> -> vector<8x8xf32>
    %cst_159 = arith.constant dense<0.000000e+00> : vector<32x8xf32>
    %180 = tpu.matmul %176, %179, %cst_159 {dimension_numbers = #tpu.dot_dimension_numbers<[1], [0], [0], [1], [0, 0, 1, 1], [], []>} : vector<32x8xf32>, vector<8x8xf32>, vector<32x8xf32> -> vector<32x8xf32>
    %181 = arith.addf %174, %180 : vector<32x8xf32>
    %c0_160 = arith.constant 0 : index
    %c0_161 = arith.constant 0 : index
    %c0_162 = arith.constant 0 : index
    %182 = vector.load %arg15[%c0_160, %c0_161, %c0_162] : memref<4x2x8xf32, #tpu.memory_space<vmem>>, vector<1x2x8xf32>
    %183 = vector.shape_cast %182 : vector<1x2x8xf32> to vector<2x8xf32>
    %cst_163 = arith.constant dense<0.000000e+00> : vector<2x32xf32>
    %184 = tpu.matmul %183, %154, %cst_163 {dimension_numbers = #tpu.dot_dimension_numbers<[1], [0], [0], [1], [0, 0, 1, 1], [], []>} : vector<2x8xf32>, vector<8x32xf32>, vector<2x32xf32> -> vector<2x32xf32>
    %c0_164 = arith.constant 0 : index
    %c0_165 = arith.constant 0 : index
    %c0_166 = arith.constant 0 : index
    %185 = vector.load %arg5[%c0_164, %c0_165, %c0_166] : memref<4x32x32xf32, #tpu.memory_space<vmem>>, vector<1x32x32xf32>
    %186 = vector.shape_cast %185 : vector<1x32x32xf32> to vector<32x32xf32>
    %cst_167 = arith.constant dense<0.000000e+00> : vector<2x32xf32>
    %187 = tpu.matmul %184, %186, %cst_167 {dimension_numbers = #tpu.dot_dimension_numbers<[1], [0], [0], [1], [0, 0, 1, 1], [], []>} : vector<2x32xf32>, vector<32x32xf32>, vector<2x32xf32> -> vector<2x32xf32>
    %c1_168 = arith.constant 1 : index
    %c0_169 = arith.constant 0 : index
    %c0_170 = arith.constant 0 : index
    %188 = vector.load %arg15[%c1_168, %c0_169, %c0_170] : memref<4x2x8xf32, #tpu.memory_space<vmem>>, vector<1x2x8xf32>
    %189 = vector.shape_cast %188 : vector<1x2x8xf32> to vector<2x8xf32>
    %cst_171 = arith.constant dense<0.000000e+00> : vector<2x32xf32>
    %190 = tpu.matmul %189, %154, %cst_171 {dimension_numbers = #tpu.dot_dimension_numbers<[1], [0], [0], [1], [0, 0, 1, 1], [], []>} : vector<2x8xf32>, vector<8x32xf32>, vector<2x32xf32> -> vector<2x32xf32>
    %c1_172 = arith.constant 1 : index
    %c0_173 = arith.constant 0 : index
    %c0_174 = arith.constant 0 : index
    %191 = vector.load %arg5[%c1_172, %c0_173, %c0_174] : memref<4x32x32xf32, #tpu.memory_space<vmem>>, vector<1x32x32xf32>
    %192 = vector.shape_cast %191 : vector<1x32x32xf32> to vector<32x32xf32>
    %cst_175 = arith.constant dense<0.000000e+00> : vector<2x32xf32>
    %193 = tpu.matmul %190, %192, %cst_175 {dimension_numbers = #tpu.dot_dimension_numbers<[1], [0], [0], [1], [0, 0, 1, 1], [], []>} : vector<2x32xf32>, vector<32x32xf32>, vector<2x32xf32> -> vector<2x32xf32>
    %194 = arith.addf %187, %193 : vector<2x32xf32>
    %c2_176 = arith.constant 2 : index
    %c0_177 = arith.constant 0 : index
    %c0_178 = arith.constant 0 : index
    %195 = vector.load %arg15[%c2_176, %c0_177, %c0_178] : memref<4x2x8xf32, #tpu.memory_space<vmem>>, vector<1x2x8xf32>
    %196 = vector.shape_cast %195 : vector<1x2x8xf32> to vector<2x8xf32>
    %cst_179 = arith.constant dense<0.000000e+00> : vector<2x32xf32>
    %197 = tpu.matmul %196, %154, %cst_179 {dimension_numbers = #tpu.dot_dimension_numbers<[1], [0], [0], [1], [0, 0, 1, 1], [], []>} : vector<2x8xf32>, vector<8x32xf32>, vector<2x32xf32> -> vector<2x32xf32>
    %c2_180 = arith.constant 2 : index
    %c0_181 = arith.constant 0 : index
    %c0_182 = arith.constant 0 : index
    %198 = vector.load %arg5[%c2_180, %c0_181, %c0_182] : memref<4x32x32xf32, #tpu.memory_space<vmem>>, vector<1x32x32xf32>
    %199 = vector.shape_cast %198 : vector<1x32x32xf32> to vector<32x32xf32>
    %cst_183 = arith.constant dense<0.000000e+00> : vector<2x32xf32>
    %200 = tpu.matmul %197, %199, %cst_183 {dimension_numbers = #tpu.dot_dimension_numbers<[1], [0], [0], [1], [0, 0, 1, 1], [], []>} : vector<2x32xf32>, vector<32x32xf32>, vector<2x32xf32> -> vector<2x32xf32>
    %201 = arith.addf %194, %200 : vector<2x32xf32>
    %c3_184 = arith.constant 3 : index
    %c0_185 = arith.constant 0 : index
    %c0_186 = arith.constant 0 : index
    %202 = vector.load %arg15[%c3_184, %c0_185, %c0_186] : memref<4x2x8xf32, #tpu.memory_space<vmem>>, vector<1x2x8xf32>
    %203 = vector.shape_cast %202 : vector<1x2x8xf32> to vector<2x8xf32>
    %cst_187 = arith.constant dense<0.000000e+00> : vector<2x32xf32>
    %204 = tpu.matmul %203, %154, %cst_187 {dimension_numbers = #tpu.dot_dimension_numbers<[1], [0], [0], [1], [0, 0, 1, 1], [], []>} : vector<2x8xf32>, vector<8x32xf32>, vector<2x32xf32> -> vector<2x32xf32>
    %c3_188 = arith.constant 3 : index
    %c0_189 = arith.constant 0 : index
    %c0_190 = arith.constant 0 : index
    %205 = vector.load %arg5[%c3_188, %c0_189, %c0_190] : memref<4x32x32xf32, #tpu.memory_space<vmem>>, vector<1x32x32xf32>
    %206 = vector.shape_cast %205 : vector<1x32x32xf32> to vector<32x32xf32>
    %cst_191 = arith.constant dense<0.000000e+00> : vector<2x32xf32>
    %207 = tpu.matmul %204, %206, %cst_191 {dimension_numbers = #tpu.dot_dimension_numbers<[1], [0], [0], [1], [0, 0, 1, 1], [], []>} : vector<2x32xf32>, vector<32x32xf32>, vector<2x32xf32> -> vector<2x32xf32>
    %208 = arith.addf %201, %207 : vector<2x32xf32>
    %c7_192 = arith.constant 7 : index
    %c0_193 = arith.constant 0 : index
    %209 = vector.load %arg9[%c7_192, %c0_193] : memref<12x32xf32, #tpu.memory_space<vmem>>, vector<1x32xf32>
    %210 = vector.broadcast %209 : vector<1x32xf32> to vector<2x32xf32>
    %211 = arith.addf %208, %210 : vector<2x32xf32>
    %cst_194 = arith.constant dense<0.000000e+00> : vector<2xf32>
    %212 = vector.multi_reduction <add>, %211, %cst_194 [1] : vector<2x32xf32> to vector<2xf32>
    %213 = vector.shape_cast %212 : vector<2xf32> to vector<2x1xf32>
    %cst_195 = arith.constant 3.200000e+01 : f32
    %214 = vector.broadcast %cst_195 : f32 to vector<2x1xf32>
    %215 = arith.divf %213, %214 : vector<2x1xf32>
    %216 = vector.broadcast %215 : vector<2x1xf32> to vector<2x32xf32>
    %217 = arith.subf %211, %216 : vector<2x32xf32>
    %218 = arith.mulf %217, %217 : vector<2x32xf32>
    %cst_196 = arith.constant dense<0.000000e+00> : vector<2xf32>
    %219 = vector.multi_reduction <add>, %218, %cst_196 [1] : vector<2x32xf32> to vector<2xf32>
    %220 = vector.shape_cast %219 : vector<2xf32> to vector<2x1xf32>
    %cst_197 = arith.constant 3.200000e+01 : f32
    %221 = vector.broadcast %cst_197 : f32 to vector<2x1xf32>
    %222 = arith.divf %220, %221 : vector<2x1xf32>
    %223 = vector.broadcast %215 : vector<2x1xf32> to vector<2x32xf32>
    %224 = arith.subf %211, %223 : vector<2x32xf32>
    %cst_198 = arith.constant 9.99999974E-6 : f32
    %225 = vector.broadcast %cst_198 : f32 to vector<2x1xf32>
    %226 = arith.addf %222, %225 : vector<2x1xf32>
    %227 = math.rsqrt %226 : vector<2x1xf32>
    %228 = vector.broadcast %227 : vector<2x1xf32> to vector<2x32xf32>
    %229 = arith.mulf %224, %228 : vector<2x32xf32>
    %c8_199 = arith.constant 8 : index
    %c0_200 = arith.constant 0 : index
    %230 = vector.load %arg9[%c8_199, %c0_200] : memref<12x32xf32, #tpu.memory_space<vmem>>, vector<1x32xf32>
    %231 = vector.broadcast %230 : vector<1x32xf32> to vector<2x32xf32>
    %232 = arith.mulf %229, %231 : vector<2x32xf32>
    %c9 = arith.constant 9 : index
    %c0_201 = arith.constant 0 : index
    %233 = vector.load %arg9[%c9, %c0_201] : memref<12x32xf32, #tpu.memory_space<vmem>>, vector<1x32xf32>
    %234 = vector.broadcast %233 : vector<1x32xf32> to vector<2x32xf32>
    %235 = arith.addf %232, %234 : vector<2x32xf32>
    %c0_202 = arith.constant 0 : index
    %c0_203 = arith.constant 0 : index
    %236 = vector.load %arg6[%c0_202, %c0_203] : memref<32x32xf32, #tpu.memory_space<vmem>>, vector<32x32xf32>
    %cst_204 = arith.constant dense<0.000000e+00> : vector<2x32xf32>
    %237 = tpu.matmul %235, %236, %cst_204 {dimension_numbers = #tpu.dot_dimension_numbers<[1], [0], [0], [1], [0, 0, 1, 1], [], []>} : vector<2x32xf32>, vector<32x32xf32>, vector<2x32xf32> -> vector<2x32xf32>
    %c10 = arith.constant 10 : index
    %c0_205 = arith.constant 0 : index
    %238 = vector.load %arg9[%c10, %c0_205] : memref<12x32xf32, #tpu.memory_space<vmem>>, vector<1x32xf32>
    %239 = vector.broadcast %238 : vector<1x32xf32> to vector<2x32xf32>
    %240 = arith.addf %237, %239 : vector<2x32xf32>
    %c0_206 = arith.constant 0 : index
    %c0_207 = arith.constant 0 : index
    %241 = vector.load %arg16[%c0_206, %c0_207] : memref<32x2xf32, #tpu.memory_space<vmem>>, vector<32x2xf32>
    %cst_208 = arith.constant dense<0.000000e+00> : vector<32x32xf32>
    %242 = tpu.matmul %241, %240, %cst_208 {dimension_numbers = #tpu.dot_dimension_numbers<[1], [0], [0], [1], [0, 0, 1, 1], [], []>} : vector<32x2xf32>, vector<2x32xf32>, vector<32x32xf32> -> vector<32x32xf32>
    %c0_209 = arith.constant 0 : index
    %c0_210 = arith.constant 0 : index
    %243 = vector.load %arg7[%c0_209, %c0_210] : memref<32x32xf32, #tpu.memory_space<vmem>>, vector<32x32xf32>
    %cst_211 = arith.constant dense<0.000000e+00> : vector<32x32xf32>
    %244 = tpu.matmul %242, %243, %cst_211 {dimension_numbers = #tpu.dot_dimension_numbers<[1], [0], [0], [1], [0, 0, 1, 1], [], []>} : vector<32x32xf32>, vector<32x32xf32>, vector<32x32xf32> -> vector<32x32xf32>
    %c0_212 = arith.constant 0 : index
    %c0_213 = arith.constant 0 : index
    %245 = vector.load %arg8[%c0_212, %c0_213] : memref<8x32xf32, #tpu.memory_space<vmem>>, vector<8x32xf32>
    %cst_214 = arith.constant dense<0.000000e+00> : vector<32x32xf32>
    %246 = tpu.matmul %181, %245, %cst_214 {dimension_numbers = #tpu.dot_dimension_numbers<[1], [0], [0], [1], [0, 0, 1, 1], [], []>} : vector<32x8xf32>, vector<8x32xf32>, vector<32x32xf32> -> vector<32x32xf32>
    %247 = arith.addf %244, %246 : vector<32x32xf32>
    %c11 = arith.constant 11 : index
    %c0_215 = arith.constant 0 : index
    %248 = vector.load %arg9[%c11, %c0_215] : memref<12x32xf32, #tpu.memory_space<vmem>>, vector<1x32xf32>
    %249 = vector.broadcast %248 : vector<1x32xf32> to vector<32x32xf32>
    %250 = arith.addf %247, %249 : vector<32x32xf32>
    %c0_216 = arith.constant 0 : index
    %c0_217 = arith.constant 0 : index
    %251 = vector.load %arg17[%c0_216, %c0_217] : memref<32x32xf32, #tpu.memory_space<vmem>>, vector<32x32xf32>
    tpu.vector_store %arg17[%c0_216, %c0_217], %250 {strides = array<i32>} : memref<32x32xf32, #tpu.memory_space<vmem>>, vector<32x32xf32>,
    return
  }
  func.func @transform_0(%arg0: i32) -> (i32, i32) {
    %c0_i32 = arith.constant 0 : i32
    %c0_i32_0 = arith.constant 0 : i32
    %c0_i32_1 = arith.constant 0 : i32
    return %c0_i32, %c0_i32_0 : i32, i32
  }
  func.func @transform_1(%arg0: i32) -> (i32, i32) {
    %c0_i32 = arith.constant 0 : i32
    %c0_i32_0 = arith.constant 0 : i32
    %c0_i32_1 = arith.constant 0 : i32
    return %c0_i32, %c0_i32_0 : i32, i32
  }
  func.func @transform_2(%arg0: i32) -> (i32, i32) {
    %c0_i32 = arith.constant 0 : i32
    %c0_i32_0 = arith.constant 0 : i32
    %c0_i32_1 = arith.constant 0 : i32
    return %c0_i32, %c0_i32_0 : i32, i32
  }
  func.func @transform_3(%arg0: i32) -> (i32, i32, i32) {
    %c0_i32 = arith.constant 0 : i32
    %c0_i32_0 = arith.constant 0 : i32
    %c0_i32_1 = arith.constant 0 : i32
    %c0_i32_2 = arith.constant 0 : i32
    return %c0_i32, %c0_i32_0, %c0_i32_1 : i32, i32, i32
  }
  func.func @transform_4(%arg0: i32) -> (i32, i32, i32) {
    %c0_i32 = arith.constant 0 : i32
    %c0_i32_0 = arith.constant 0 : i32
    %c0_i32_1 = arith.constant 0 : i32
    %c0_i32_2 = arith.constant 0 : i32
    return %c0_i32, %c0_i32_0, %c0_i32_1 : i32, i32, i32
  }
  func.func @transform_5(%arg0: i32) -> (i32, i32) {
    %c0_i32 = arith.constant 0 : i32
    %c0_i32_0 = arith.constant 0 : i32
    %c0_i32_1 = arith.constant 0 : i32
    return %c0_i32, %c0_i32_0 : i32, i32
  }
  func.func @transform_6(%arg0: i32) -> (i32, i32) {
    %c0_i32 = arith.constant 0 : i32
    %c0_i32_0 = arith.constant 0 : i32
    %c0_i32_1 = arith.constant 0 : i32
    return %c0_i32, %c0_i32_0 : i32, i32
  }
  func.func @transform_7(%arg0: i32) -> (i32, i32) {
    %c0_i32 = arith.constant 0 : i32
    %c0_i32_0 = arith.constant 0 : i32
    %c0_i32_1 = arith.constant 0 : i32
    return %c0_i32, %c0_i32_0 : i32, i32
  }
  func.func @transform_8(%arg0: i32) -> (i32, i32) {
    %c0_i32 = arith.constant 0 : i32
    %c0_i32_0 = arith.constant 0 : i32
    %c0_i32_1 = arith.constant 0 : i32
    return %c0_i32, %c0_i32_0 : i32, i32
  }
  func.func @transform_9(%arg0: i32) -> (i32, i32, i32) {
    %c0_i32 = arith.constant 0 : i32
    %c0_i32_0 = arith.constant 0 : i32
    %c0_i32_1 = arith.constant 0 : i32
    %c0_i32_2 = arith.constant 0 : i32
    return %c0_i32, %c0_i32_0, %c0_i32_1 : i32, i32, i32
  }
  func.func @transform_10(%arg0: i32) -> (i32, i32, i32) {
    %c0_i32 = arith.constant 0 : i32
    %c0_i32_0 = arith.constant 0 : i32
    %c0_i32_1 = arith.constant 0 : i32
    %c0_i32_2 = arith.constant 0 : i32
    return %c0_i32, %c0_i32_0, %c0_i32_1 : i32, i32, i32
  }
  func.func @transform_11(%arg0: i32) -> (i32, i32, i32) {
    %c0_i32 = arith.constant 0 : i32
    %c0_i32_0 = arith.constant 0 : i32
    %c0_i32_1 = arith.constant 0 : i32
    %c0_i32_2 = arith.constant 0 : i32
    return %c0_i32, %c0_i32_0, %c0_i32_1 : i32, i32, i32
  }
  func.func @transform_12(%arg0: i32) -> (i32, i32, i32) {
    %c0_i32 = arith.constant 0 : i32
    %c0_i32_0 = arith.constant 0 : i32
    %c0_i32_1 = arith.constant 0 : i32
    %c0_i32_2 = arith.constant 0 : i32
    return %c0_i32, %c0_i32_0, %c0_i32_1 : i32, i32, i32
  }
  func.func @transform_13(%arg0: i32) -> (i32, i32, i32) {
    %c0_i32 = arith.constant 0 : i32
    %c0_i32_0 = arith.constant 0 : i32
    %c0_i32_1 = arith.constant 0 : i32
    %c0_i32_2 = arith.constant 0 : i32
    return %c0_i32, %c0_i32_0, %c0_i32_1 : i32, i32, i32
  }
  func.func @transform_14(%arg0: i32) -> (i32, i32, i32) {
    %c0_i32 = arith.constant 0 : i32
    %c0_i32_0 = arith.constant 0 : i32
    %c0_i32_1 = arith.constant 0 : i32
    %c0_i32_2 = arith.constant 0 : i32
    return %c0_i32, %c0_i32_0, %c0_i32_1 : i32, i32, i32
  }
  func.func @transform_15(%arg0: i32) -> (i32, i32) {
    %c0_i32 = arith.constant 0 : i32
    %c0_i32_0 = arith.constant 0 : i32
    %c0_i32_1 = arith.constant 0 : i32
    return %c0_i32, %c0_i32_0 : i32, i32
  }
  func.func @transform_16(%arg0: i32) -> (i32, i32) {
    %c0_i32 = arith.constant 0 : i32
    %c0_i32_0 = arith.constant 0 : i32
    %c0_i32_1 = arith.constant 0 : i32
    return %c0_i32, %c0_i32_0 : i32, i32
  }
}

</mosaic_0001>

<bundles_post_ra>
// kernel: _lambda_.1
= control target key start
LH: loop header
LB: loop body
LE: loop exit
PB: predicated region body
PF: predicated region fallthrough
CT: control target
= control target key end

     0   :  { %vm68_vm0 = vcmask 392192   ;;  %vm175_vm1 = vcmask 261120   ;;  %v4929_v23 = vmov 0.0   ;;  %vm4930_vm2 = vmmov 0   ;;  %s5789_s1 = inlined_call_operand.vmem [shape: f32[48,32], index: 1, kind: input, shape index: {}]   ;;  %s5790_s0 = inlined_call_operand.vmem [shape: f32[32,48], index: 0, kind: input, shape index: {}]   ;;  %s5791_s2 = inlined_call_operand.vmem [shape: f32[32,8], index: 2, kind: input, shape index: {}]   ;;  %s5792_s8 = inlined_call_operand.vmem [shape: f32[12,32], index: 8, kind: input, shape index: {}]   ;;  %s5793_s9 = inlined_call_operand.vmem [shape: f32[4,8,32], index: 9, kind: input, shape index: {}]   ;;  %s5794_s10 = inlined_call_operand.vmem [shape: f32[4,8,32], index: 10, kind: input, shape index: {}]   ;;  %s5795_s11 = inlined_call_operand.vmem [shape: f32[9,8,8], index: 11, kind: input, shape index: {}]   ;;  %s5796_s3 = inlined_call_operand.vmem [shape: f32[9,32,32], index: 3, kind: input, shape index: {}]   ;;  %s5797_s13 = inlined_call_operand.vmem [shape: f32[4,32,8], index: 13, kind: input, shape index: {}]   ;;  %s5798_s12 = inlined_call_operand.vmem [shape: f32[4,32,8], index: 12, kind: input, shape index: {}]   ;;  %s5799_s14 = inlined_call_operand.vmem [shape: f32[4,2,8], index: 14, kind: input, shape index: {}]   ;;  %s5800_s4 = inlined_call_operand.vmem [shape: f32[4,32,32], index: 4, kind: input, shape index: {}]   ;;  %s5801_s5 = inlined_call_operand.vmem [shape: f32[32,32], index: 5, kind: input, shape index: {}]   ;;  %s5802_s7 = inlined_call_operand.vmem [shape: f32[8,32], index: 7, kind: input, shape index: {}]   ;;  %s5803_s15 = inlined_call_operand.vmem [shape: f32[32,2], index: 15, kind: input, shape index: {}]   ;;  %s5804_s6 = inlined_call_operand.vmem [shape: f32[32,32], index: 6, kind: input, shape index: {}]   ;;  %s5805_s16 = inlined_call_operand.vmem [shape: f32[32,32], index: 16, kind: output, shape index: {}]  }
   0x1   :  { %5807 = sst [smem:[#allocation2_spill]] %s5789_s1  ;;  %v53_v3 = vld [vmem:[%s5790_s0] sm:$0xff]  ;;  %v169_v4 = vld [vmem:[%s5791_s2 + $0x18] sm:$0xff]  ;;  %v54_v8 = vld [vmem:[%s5790_s0 + $0x8] sm:$0xff]  ;;  %vm275_vm3 = vcmask 64512   ;;  %vm3697_vm4 = vcmask 254976  }
   0x2   :  { %s5808_s23 = sld [smem:[#allocation2_spill]]  ;;  %4512 = vmatprep.mubr.msk.f32.mxu0 %vm68_vm0, %v53_v3  ;;  %4518 = vmatprep.subr.mxu1 %v169_v4  ;;  %v55_v9 = vld [vmem:[%s5790_s0 + $0x10] sm:$0xff]  ;;  %v56_v10 = vld [vmem:[%s5790_s0 + $0x18] sm:$0xff]  ;;  %v167_v12 = vld [vmem:[%s5791_s2 + $0x8] sm:$0xff]  ;;  %vm3809_vm5 = vcmask 15360   ;;  %vm3822_vm6 = vcmask 1041408  }
   0x3   :  { %4519 = vmatpush3.msra.mxu1 %v169_v4  ;;  %v168_v11 = vld [vmem:[%s5791_s2 + $0x10] sm:$0xff]  ;;  %v166_v13 = vld [vmem:[%s5791_s2] sm:$0xff] }
   0x4   :  { %4520 = vmatprep.subr.mxu1 %v168_v11  ;;  %v4127_v15 = vld [vmem:[%s5792_s8] ss:$0 sm:$0xff]  ;;  %v4132_v25 = vld [vmem:[%s5792_s8 + $0x1] ss:$0 sm:$0xff] }
   0x5   :  { %4521 = vmatpush3.msra.mxu1 %v168_v11 }
   0x6   :  { %4522 = vmatprep.subr.mxu1 %v167_v12 }
   0x7   :  { %4523 = vmatpush3.msra.mxu1 %v167_v12  ;;  %v4138_v12 = vld [vmem:[%s5792_s8 + $0x3] ss:$0 sm:$0xff] }
   0x8   :  { %v62_v0 = vld [vmem:[%s5808_s23 + $0x28] sm:$0xff]  ;;  %v61_v1 = vld [vmem:[%s5808_s23 + $0x20] sm:$0xff]  ;;  %v60_v2 = vld [vmem:[%s5808_s23 + $0x18] sm:$0xff]  ;;  %4524 = vmatprep.subr.mxu1 %v166_v13 }
   0x9   :  { %4500 = vmatprep.subr.mxu0 %v62_v0  ;;  %v59_v5 = vld [vmem:[%s5808_s23 + $0x10] sm:$0xff]  ;;  %v58_v6 = vld [vmem:[%s5808_s23 + $0x8] sm:$0xff]  ;;  %v57_v7 = vld [vmem:[%s5808_s23] sm:$0xff]  ;;  %4525 = vmatpush3.msra.mxu1 %v166_v13 }
   0xa   :  { %4501 = vmatpush3.msra.mxu0 %v62_v0  ;;  %4532 = vmatprep.subr.mxu1 %v4929_v23 }
   0xb   :  { %4502 = vmatprep.subr.mxu0 %v61_v1 }
   0xc   :  { %4503 = vmatpush3.msra.mxu0 %v61_v1 }
   0xd   :  { %4504 = vmatprep.subr.mxu0 %v60_v2 }
   0xe   :  { %4505 = vmatpush3.msra.mxu0 %v60_v2 }
   0xf   :  { %4506 = vmatprep.subr.mxu0 %v59_v5 }
  0x10   :  { %4507 = vmatpush3.msra.mxu0 %v59_v5 }
  0x11   :  { %4508 = vmatprep.subr.mxu0 %v58_v6 }
  0x12   :  { %4509 = vmatpush3.msra.mxu0 %v58_v6 }
  0x13   :  { %4510 = vmatprep.subr.mxu0 %v57_v7 }
  0x14   :  { %4511 = vmatpush3.msra.mxu0 %v57_v7  ;;  %v4137_v7 = vld [vmem:[%s5792_s8 + $0x2] ss:$0 sm:$0xff] }
  0x15   :  { %4513 = vmatmul.mubr.msk.f32.vlgmr.msra.gmra.mxu0 %vm68_vm0, %v54_v8  ;;  %4543 = vmatprep.subr.mxu0 %v4929_v23 }
  0x16   :  { %4515 = vmatprep.mubr.msk.f32.mxu0 %vm68_vm0, %v55_v9 }
  0x19   :  { %4516 = vmatmul.mubr.msk.f32.gmra.mxu0 %vm68_vm0, %v56_v10 }
  0x1a   :  { %4551 = vmatprep.mubr.msk.f32.mxu0 %vm4930_vm2, %v4929_v23 }
  0xd5   :  { %v4514_v14 = vpop.f32.mrf.mxu0 }
  0xd6   :  { %v153_v18 = vadd.f32 %v4514_v14, %v4127_v15 }
  0xd7   :  { %v147_v16 = vpop.f32.mrf.mxu0 }
  0xd8   :  { %v148_v17 = vadd.f32 %v4127_v15, %v147_v16 }
  0xd9   :  { %v4517_v19 = vpop.f32.mrf.mxu0 }
  0xda   :  { %4526 = vmatprep.mubr.msk.f32.mxu1 %vm175_vm1, %v148_v17  ;;  %v163_v22 = vadd.f32 %v4517_v19, %v4127_v15 }
  0xdb   :  { %v157_v20 = vpop.f32.mrf.mxu0  ;;  %4527 = vmatmul.mubr.msk.f32.vlgmr.msra.gmra.mxu1 %vm175_vm1, %v153_v18 }
  0xdc   :  { %v158_v21 = vadd.f32 %v4127_v15, %v157_v20 }
  0xde   :  { %4529 = vmatprep.mubr.msk.f32.mxu1 %vm175_vm1, %v158_v21 }
  0xdf   :  { %4530 = vmatmul.mubr.msk.f32.gmra.mxu1 %vm175_vm1, %v163_v22 }
  0xe0   :  { %4540 = vmatprep.mubr.msk.f32.mxu1 %vm4930_vm2, %v4929_v23 }
 0x19b   :  { %v4528_v24 = vpop.f32.mrf.mxu1 }
 0x19c   :  { %v260_v27 = vadd.f32 %v4528_v24, %v4132_v25 }
 0x19d   :  { %v254_v26 = vpop.f32.mrf.mxu1 }
 0x19e   :  { %v255_v28 = vadd.f32 %v4132_v25, %v254_v26  ;;  %v277_v32 = vsel %vm275_vm3, %v260_v27, 0.0  ;;  %v339_v26 = vld [vmem:[%s5793_s9] sm:$0xff] }
 0x19f   :  { %v4531_v29 = vpop.f32.mrf.mxu1 }
 0x1a0   :  { %v276_v30 = vsel %vm275_vm3, %v255_v28, 0.0  ;;  %v270_v33 = vadd.f32 %v4531_v29, %v4132_v25  ;;  %v413_v29 = vld [vmem:[%s5794_s10] sm:$0xff] }
 0x1a1   :  { %v264_v31 = vpop.f32.mrf.mxu1  ;;  %v278_v35 = vadd.f32 %v277_v32, %v276_v30 }
 0x1a2   :  { %v265_v34 = vadd.f32 %v4132_v25, %v264_v31  ;;  %v281_v38 = vsel %vm275_vm3, %v270_v33, 0.0 }
 0x1a4   :  { %v279_v36 = vsel %vm275_vm3, %v265_v34, 0.0 }
 0x1a5   :  { %v280_v37 = vadd.f32 %v279_v36, %v278_v35  ;;  %v4147_v35 = vld [vmem:[%s5794_s10 + $0x10] sm:$0xff] }
 0x1a7   :  { %v282_v39 = vadd.f32 %v281_v38, %v280_v37 }
 0x1a9   :  { %v283_v40 = vrot.slane %v282_v39, 4 }
 0x1ab   :  { %v284_v41 = vadd.f32 %v283_v40, %v282_v39 }
 0x1ad   :  { %v285_v42 = vrot.slane %v284_v41, 2 }
 0x1af   :  { %v286_v43 = vadd.f32 %v285_v42, %v284_v41 }
 0x1b1   :  { %v287_v44 = vrot.slane %v286_v43, 1 }
 0x1b3   :  { %v288_v45 = vadd.f32 %v287_v44, %v286_v43  ;;  %v4149_v43 = vld [vmem:[%s5793_s9 + $0x18] sm:$0xff] }
 0x1b4   :  { %v4151_v44 = vld [vmem:[%s5794_s10 + $0x18] sm:$0xff] }
 0x1b5   :  { %v290_v46 = vmul.f32 0.03125, %v288_v45 }
 0x1b7   :  { %v291_v47 = vsub.f32 %v255_v28, %v290_v46  ;;  %v292_v48 = vsub.f32 %v260_v27, %v290_v46  ;;  %v293_v49 = vsub.f32 %v265_v34, %v290_v46  ;;  %v294_v50 = vsub.f32 %v270_v33, %v290_v46  ;;  %v4140_v27 = vld [vmem:[%s5793_s9 + $0x8] sm:$0xff]  ;;  %v4145_v34 = vld [vmem:[%s5793_s9 + $0x10] sm:$0xff] }
 0x1b8   :  { %v4142_v28 = vld [vmem:[%s5794_s10 + $0x8] sm:$0xff] }
 0x1b9   :  { %v295_v51 = vmul.f32 %v291_v47, %v291_v47  ;;  %v296_v52 = vmul.f32 %v292_v48, %v292_v48  ;;  %v297_v53 = vmul.f32 %v293_v49, %v293_v49  ;;  %v298_v54 = vmul.f32 %v294_v50, %v294_v50 }
 0x1bb   :  { %v299_v55 = vsel %vm275_vm3, %v295_v51, 0.0  ;;  %v300_v56 = vsel %vm275_vm3, %v296_v52, 0.0  ;;  %v302_v58 = vsel %vm275_vm3, %v297_v53, 0.0  ;;  %v304_v60 = vsel %vm275_vm3, %v298_v54, 0.0  ;;  %v939_v52 = vld [vmem:[%s5795_s11] sm:$0xff]  ;;  %v4154_v53 = vld [vmem:[%s5795_s11 + $0x8] sm:$0xff] }
 0x1bc   :  { %v301_v57 = vadd.f32 %v300_v56, %v299_v55  ;;  %v4159_v55 = vld [vmem:[%s5796_s3 + $0x38] sm:$0xff] }
 0x1bd   :  { %v1016_v56 = vld [vmem:[%s5796_s3 + $0x18] sm:$0xff] }
 0x1be   :  { %v303_v59 = vadd.f32 %v302_v58, %v301_v57  ;;  %v4158_v57 = vld [vmem:[%s5796_s3 + $0x30] sm:$0xff] }
 0x1bf   :  { %v1015_v58 = vld [vmem:[%s5796_s3 + $0x10] sm:$0xff] }
 0x1c0   :  { %v305_v61 = vadd.f32 %v304_v60, %v303_v59  ;;  %v4157_v59 = vld [vmem:[%s5796_s3 + $0x28] sm:$0xff] }
 0x1c1   :  { %v1014_v60 = vld [vmem:[%s5796_s3 + $0x8] sm:$0xff] }
 0x1c2   :  { %v306_v62 = vrot.slane %v305_v61, 4 }
 0x1c4   :  { %v307_v63 = vadd.f32 %v306_v62, %v305_v61  ;;  %v4156_v61 = vld [vmem:[%s5796_s3 + $0x20] sm:$0xff] }
 0x1c5   :  { %v1013_v62 = vld [vmem:[%s5796_s3] sm:$0xff] }
 0x1c6   :  { %v308_v0 = vrot.slane %v307_v63, 2 }
 0x1c8   :  { %v309_v1 = vadd.f32 %v308_v0, %v307_v63 }
 0x1ca   :  { %v310_v2 = vrot.slane %v309_v1, 1 }
 0x1cc   :  { %v311_v3 = vadd.f32 %v310_v2, %v309_v1  ;;  %v4167_v1 = vld [vmem:[%s5796_s3 + $0x58] sm:$0xff] }
 0x1ce   :  { %v312_v4 = vmul.f32 0.03125, %v311_v3  ;;  %v4162_v3 = vld [vmem:[%s5795_s11 + $0x10] sm:$0xff] }
 0x1d0   :  { %v313_v5 = vadd.f32 1e-05, %v312_v4 }
 0x1d2   :  { %4923 = vrsqrt.f32 %v313_v5  ;;  %v4166_v5 = vld [vmem:[%s5796_s3 + $0x50] sm:$0xff] }
 0x1df   :  { %v4924_v6 = vpop.eup %4923 }
 0x1e0   :  { %v317_v8 = vmul.f32 %v4924_v6, %v293_v49  ;;  %v318_v9 = vmul.f32 %v4924_v6, %v294_v50  ;;  %v316_v10 = vmul.f32 %v4924_v6, %v292_v48  ;;  %v315_v11 = vmul.f32 %v4924_v6, %v291_v47  ;;  %v4169_v6 = vld [vmem:[%s5795_s11 + $0x18] sm:$0xff] }
 0x1e2   :  { %v325_v13 = vmul.f32 %v4137_v7, %v317_v8  ;;  %v326_v14 = vmul.f32 %v4137_v7, %v318_v9  ;;  %v324_v15 = vmul.f32 %v4137_v7, %v316_v10  ;;  %v323_v18 = vmul.f32 %v4137_v7, %v315_v11  ;;  %v4165_v7 = vld [vmem:[%s5796_s3 + $0x48] sm:$0xff]  ;;  %v4174_v8 = vld [vmem:[%s5796_s3 + $0x78] sm:$0xff]  ;;  %v4164_v9 = vld [vmem:[%s5796_s3 + $0x40] sm:$0xff] }
 0x1e3   :  { %v4173_v10 = vld [vmem:[%s5796_s3 + $0x70] sm:$0xff]  ;;  %v4172_v11 = vld [vmem:[%s5796_s3 + $0x68] sm:$0xff] }
 0x1e4   :  { %v334_v16 = vadd.f32 %v4138_v12, %v326_v14  ;;  %v333_v17 = vadd.f32 %v4138_v12, %v325_v13  ;;  %v332_v20 = vadd.f32 %v4138_v12, %v324_v15  ;;  %v331_v22 = vadd.f32 %v4138_v12, %v323_v18  ;;  %v4171_v12 = vld [vmem:[%s5796_s3 + $0x60] sm:$0xff] }
 0x1e6   :  { %v5092_v19 = vmax.f32 %v334_v16, 0.0  ;;  %v5096_v21 = vmax.f32 %v333_v17, 0.0  ;;  %v336_v24 = vmax.f32 %v332_v20, 0.0  ;;  %v335_v25 = vmax.f32 %v331_v22, 0.0  ;;  %v4176_v20 = vld [vmem:[%s5795_s11 + $0x20] sm:$0xff]  ;;  %v4181_v22 = vld [vmem:[%s5796_s3 + $0x98] sm:$0xff] }
 0x1e8   :  { %4533 = vmatpush3.msra.mxu1 %v5092_v19  ;;  %4544 = vmatpush3.msra.mxu0 %v5092_v19 }
 0x1e9   :  { %4534 = vmatprep.subr.mxu1 %v4929_v23  ;;  %4545 = vmatprep.subr.mxu0 %v4929_v23 }
 0x1ea   :  { %4535 = vmatpush3.msra.mxu1 %v5096_v21  ;;  %4546 = vmatpush3.msra.mxu0 %v5096_v21 }
 0x1eb   :  { %4536 = vmatprep.subr.mxu1 %v4929_v23  ;;  %4547 = vmatprep.subr.mxu0 %v4929_v23 }
 0x1ec   :  { %4537 = vmatpush3.msra.mxu1 %v336_v24  ;;  %4548 = vmatpush3.msra.mxu0 %v336_v24 }
 0x1ed   :  { %4538 = vmatprep.subr.mxu1 %v4929_v23  ;;  %4549 = vmatprep.subr.mxu0 %v4929_v23 }
 0x1ee   :  { %4539 = vmatpush3.msra.mxu1 %v335_v25  ;;  %4550 = vmatpush3.msra.mxu0 %v335_v25 }
 0x1ef   :  { %4541 = vmatmul.mubr.msk.f32.vlgmr.msra.gmra.mxu1 %vm175_vm1, %v339_v26  ;;  %4552 = vmatmul.mubr.msk.f32.vlgmr.msra.gmra.mxu0 %vm175_vm1, %v4140_v27  ;;  %v4179_v27 = vld [vmem:[%s5796_s3 + $0x88] sm:$0xff] }
 0x1f0   :  { %4554 = vmatprep.subr.mxu1 %v4929_v23  ;;  %4559 = vmatprep.subr.mxu0 %v4929_v23 }
 0x1f1   :  { %4555 = vmatpush3.msra.mxu1 %v4142_v28  ;;  %4556 = vmatprep.mubr.msk.f32.mxu1 %vm4930_vm2, %v4929_v23  ;;  %v4188_v28 = vld [vmem:[%s5796_s3 + $0xb8] sm:$0xff] }
 0x1f2   :  { %4561 = vmatprep.mubr.msk.f32.mxu0 %vm4930_vm2, %v4929_v23  ;;  %4564 = vmatprep.subr.mxu1 %v4929_v23 }
 0x1f3   :  { %4560 = vmatpush3.msra.mxu0 %v413_v29  ;;  %v4178_v29 = vld [vmem:[%s5796_s3 + $0x80] sm:$0xff] }
 0x1f4   :  { %4575 = vmatprep.subr.mxu0 %v4929_v23 }
 0x2af   :  { %v409_v30 = vpop.f32.mrf.mxu1  ;;  %v485_v31 = vpop.f32.mrf.mxu0 }
 0x2b0   :  { %4557 = vmatmul.mubr.msk.f32.vlgmr.msra.gmra.mxu1 %vm275_vm3, %v485_v31  ;;  %4562 = vmatmul.mubr.msk.f32.vlgmr.msra.gmra.mxu0 %vm275_vm3, %v409_v30  ;;  %v4187_v30 = vld [vmem:[%s5796_s3 + $0xb0] sm:$0xff]  ;;  %v4186_v31 = vld [vmem:[%s5796_s3 + $0xa8] sm:$0xff] }
 0x2b1   :  { %4565 = vmatpush3.msra.mxu1 %v5092_v19  ;;  %v4553_v32 = vpop.f32.mrf.mxu0  ;;  %4572 = vmatprep.mubr.msk.f32.mxu1 %vm4930_vm2, %v4929_v23  ;;  %v4542_v33 = vpop.f32.mrf.mxu1 }
 0x2b2   :  { %4566 = vmatprep.subr.mxu1 %v4929_v23  ;;  %4577 = vmatprep.mubr.msk.f32.mxu0 %vm4930_vm2, %v4929_v23  ;;  %v4185_v32 = vld [vmem:[%s5796_s3 + $0xa0] sm:$0xff] }
 0x2b3   :  { %4567 = vmatpush3.msra.mxu1 %v5096_v21  ;;  %4576 = vmatpush3.msra.mxu0 %v4147_v35 }
 0x2b4   :  { %4568 = vmatprep.subr.mxu1 %v4929_v23  ;;  %4580 = vmatprep.subr.mxu0 %v4929_v23 }
 0x2b5   :  { %4569 = vmatpush3.msra.mxu1 %v336_v24 }
 0x2b6   :  { %4570 = vmatprep.subr.mxu1 %v4929_v23 }
 0x2b7   :  { %4571 = vmatpush3.msra.mxu1 %v335_v25 }
 0x2b8   :  { %4573 = vmatmul.mubr.msk.f32.vlgmr.msra.gmra.mxu1 %vm175_vm1, %v4145_v34  ;;  %4591 = vmatprep.subr.mxu1 %v4929_v23 }
 0x2b9   :  { %4593 = vmatprep.mubr.msk.f32.mxu1 %vm4930_vm2, %v4929_v23  ;;  %4592 = vmatpush3.msra.mxu1 %v4151_v44  ;;  %v4197_v44 = vld [vmem:[%s5795_s11 + $0x38] sm:$0xff] }
 0x2ba   :  { %4596 = vmatprep.subr.mxu1 %v4929_v23 }
 0x370   :  { %v560_v36 = vpop.f32.mrf.mxu1  ;;  %v633_v37 = vpop.f32.mrf.mxu0 }
 0x371   :  { %v634_v38 = vadd.f32 %v633_v37, %v560_v36 }
 0x372   :  { %v4558_v39 = vpop.f32.mrf.mxu1  ;;  %v4563_v40 = vpop.f32.mrf.mxu0 }
 0x378   :  { %v708_v41 = vpop.f32.mrf.mxu1 }
 0x379   :  { %4578 = vmatmul.mubr.msk.f32.vlgmr.msra.gmra.mxu0 %vm275_vm3, %v708_v41  ;;  %v4190_v41 = vld [vmem:[%s5795_s11 + $0x30] sm:$0xff] }
 0x37a   :  { %4581 = vmatpush3.msra.mxu0 %v5092_v19  ;;  %v4574_v42 = vpop.f32.mrf.mxu1  ;;  %4588 = vmatprep.mubr.msk.f32.mxu0 %vm4930_vm2, %v4929_v23 }
 0x37b   :  { %4582 = vmatprep.subr.mxu0 %v4929_v23 }
 0x37c   :  { %4583 = vmatpush3.msra.mxu0 %v5096_v21 }
 0x37d   :  { %4584 = vmatprep.subr.mxu0 %v4929_v23 }
 0x37e   :  { %4585 = vmatpush3.msra.mxu0 %v336_v24  ;;  %v4183_v24 = vld [vmem:[%s5795_s11 + $0x28] sm:$0xff] }
 0x37f   :  { %4586 = vmatprep.subr.mxu0 %v4929_v23 }
 0x380   :  { %4587 = vmatpush3.msra.mxu0 %v335_v25  ;;  %v4180_v25 = vld [vmem:[%s5796_s3 + $0x90] sm:$0xff] }
 0x381   :  { %4589 = vmatmul.mubr.msk.f32.vlgmr.msra.gmra.mxu0 %vm175_vm1, %v4149_v43  ;;  %4601 = vmatprep.subr.mxu0 %v4929_v23  ;;  %v4195_v43 = vld [vmem:[%s5796_s3 + $0xd8] sm:$0xff] }
 0x382   :  { %4603 = vmatprep.mubr.msk.f32.mxu0 %vm4930_vm2, %v4929_v23 }
 0x439   :  { %v783_v45 = vpop.f32.mrf.mxu0 }
 0x43a   :  { %v787_v46 = vadd.f32 %v783_v45, %v634_v38  ;;  %v4194_v45 = vld [vmem:[%s5796_s3 + $0xd0] sm:$0xff] }
 0x43b   :  { %v4579_v47 = vpop.f32.mrf.mxu0 }
 0x43c   :  { %v4193_v47 = vld [vmem:[%s5796_s3 + $0xc8] sm:$0xff] }
 0x441   :  { %v859_v48 = vpop.f32.mrf.mxu0 }
 0x442   :  { %4594 = vmatmul.mubr.msk.f32.vlgmr.msra.gmra.mxu1 %vm275_vm3, %v859_v48  ;;  %v4202_v48 = vld [vmem:[%s5796_s3 + $0xf8] sm:$0xff] }
 0x443   :  { %v4590_v49 = vpop.f32.mrf.mxu0  ;;  %4598 = vmatprep.mubr.msk.f32.mxu1 %vm4930_vm2, %v4929_v23 }
 0x444   :  { %v4192_v49 = vld [vmem:[%s5796_s3 + $0xc0] sm:$0xff] }
 0x502   :  { %v934_v50 = vpop.f32.mrf.mxu1 }
 0x503   :  { %v5172_v51 = vadd.f32 %v934_v50, %v787_v46  ;;  %v4201_v50 = vld [vmem:[%s5796_s3 + $0xf0] sm:$0xff] }
 0x504   :  { %v4595_v54 = vpop.f32.mrf.mxu1 }
 0x505   :  { %4597 = vmatpush3.msra.mxu1 %v5172_v51  ;;  %4602 = vmatpush3.msra.mxu0 %v5172_v51 }
 0x506   :  { %4599 = vmatmul.mubr.msk.f32.vlgmr.msra.gmra.mxu1 %vm275_vm3, %v939_v52  ;;  %4604 = vmatmul.mubr.msk.f32.vlgmr.msra.gmra.mxu0 %vm275_vm3, %v4154_v53  ;;  %v4200_v52 = vld [vmem:[%s5796_s3 + $0xe8] sm:$0xff]  ;;  %v4199_v53 = vld [vmem:[%s5796_s3 + $0xe0] sm:$0xff] }
 0x507   :  { %4606 = vmatprep.subr.mxu1 %v4929_v23  ;;  %4617 = vmatprep.subr.mxu0 %v4929_v23 }
 0x508   :  { %4607 = vmatpush3.msra.mxu1 %v4159_v55  ;;  %4618 = vmatpush3.msra.mxu0 %v1016_v56 }
 0x509   :  { %4608 = vmatprep.subr.mxu1 %v4929_v23  ;;  %4619 = vmatprep.subr.mxu0 %v4929_v23 }
 0x50a   :  { %4609 = vmatpush3.msra.mxu1 %v4158_v57  ;;  %4620 = vmatpush3.msra.mxu0 %v1015_v58 }
 0x50b   :  { %4610 = vmatprep.subr.mxu1 %v4929_v23  ;;  %4621 = vmatprep.subr.mxu0 %v4929_v23 }
 0x50c   :  { %4611 = vmatpush3.msra.mxu1 %v4157_v59  ;;  %4622 = vmatpush3.msra.mxu0 %v1014_v60 }
 0x50d   :  { %4612 = vmatprep.subr.mxu1 %v4929_v23  ;;  %4623 = vmatprep.subr.mxu0 %v4929_v23 }
 0x50e   :  { %4613 = vmatpush3.msra.mxu1 %v4156_v61  ;;  %4614 = vmatprep.mubr.msk.f32.mxu1 %vm4930_vm2, %v4929_v23 }
 0x50f   :  { %4625 = vmatprep.mubr.msk.f32.mxu0 %vm4930_vm2, %v4929_v23  ;;  %4628 = vmatprep.subr.mxu1 %v4929_v23 }
 0x510   :  { %4624 = vmatpush3.msra.mxu0 %v1013_v62  ;;  %v4204_v62 = vld [vmem:[%s5795_s11 + $0x40] sm:$0xff] }
 0x511   :  { %4633 = vmatprep.subr.mxu0 %v4929_v23 }
 0x5c6   :  { %v1009_v63 = vpop.f32.mrf.mxu1  ;;  %v1088_v0 = vpop.f32.mrf.mxu0 }
 0x5c7   :  { %4615 = vmatmul.mubr.msk.f32.vlgmr.msra.gmra.mxu1 %vm175_vm1, %v1088_v0  ;;  %4626 = vmatmul.mubr.msk.f32.vlgmr.msra.gmra.mxu0 %vm175_vm1, %v1009_v63  ;;  %v4209_v63 = vld [vmem:[%s5796_s3 + $0x118] sm:$0xff] }
 0x5c8   :  { %4629 = vmatpush3.msra.mxu1 %v5172_v51  ;;  %v4605_v2 = vpop.f32.mrf.mxu0  ;;  %4630 = vmatprep.mubr.msk.f32.mxu1 %vm4930_vm2, %v4929_v23  ;;  %v4600_v4 = vpop.f32.mrf.mxu1 }
 0x5c9   :  { %4644 = vmatprep.subr.mxu1 %v4929_v23  ;;  %4634 = vmatpush3.msra.mxu0 %v4167_v1  ;;  %v4208_v1 = vld [vmem:[%s5796_s3 + $0x110] sm:$0xff]  ;;  %v4207_v2 = vld [vmem:[%s5796_s3 + $0x108] sm:$0xff] }
 0x5ca   :  { %4635 = vmatprep.subr.mxu0 %v4929_v23  ;;  %4641 = vmatprep.mubr.msk.f32.mxu0 %vm4930_vm2, %v4929_v23 }
 0x5cb   :  { %4631 = vmatmul.mubr.msk.f32.vlgmr.msra.gmra.mxu1 %vm275_vm3, %v4162_v3  ;;  %4636 = vmatpush3.msra.mxu0 %v4166_v5  ;;  %v4206_v3 = vld [vmem:[%s5796_s3 + $0x100] sm:$0xff] }
 0x5cc   :  { %4645 = vmatpush3.msra.mxu1 %v5172_v51  ;;  %4646 = vmatprep.mubr.msk.f32.mxu1 %vm4930_vm2, %v4929_v23 }
 0x5cd   :  { %4637 = vmatprep.subr.mxu0 %v4929_v23  ;;  %4649 = vmatprep.subr.mxu1 %v4929_v23 }
 0x5ce   :  { %4638 = vmatpush3.msra.mxu0 %v4165_v7 }
 0x5cf   :  { %4647 = vmatmul.mubr.msk.f32.vlgmr.msra.gmra.mxu1 %vm275_vm3, %v4169_v6  ;;  %4639 = vmatprep.subr.mxu0 %v4929_v23 }
 0x5d0   :  { %4657 = vmatprep.mubr.msk.f32.mxu1 %vm4930_vm2, %v4929_v23  ;;  %4650 = vmatpush3.msra.mxu1 %v4174_v8 }
 0x5d1   :  { %4651 = vmatprep.subr.mxu1 %v4929_v23  ;;  %4640 = vmatpush3.msra.mxu0 %v4164_v9 }
 0x5d2   :  { %4652 = vmatpush3.msra.mxu1 %v4173_v10  ;;  %4660 = vmatprep.subr.mxu0 %v4929_v23 }
 0x5d3   :  { %4653 = vmatprep.subr.mxu1 %v4929_v23 }
 0x5d4   :  { %4654 = vmatpush3.msra.mxu1 %v4172_v11 }
 0x5d5   :  { %4655 = vmatprep.subr.mxu1 %v4929_v23 }
 0x5d6   :  { %4656 = vmatpush3.msra.mxu1 %v4171_v12  ;;  %v2369_v12 = vld [vmem:[%s5797_s13 + $0x18] sm:$0xff] }
 0x5d7   :  { %4676 = vmatprep.subr.mxu1 %v4929_v23 }
 0x687   :  { %v1166_v13 = vpop.f32.mrf.mxu1  ;;  %v1239_v14 = vpop.f32.mrf.mxu0 }
 0x688   :  { %v1240_v15 = vadd.f32 %v1239_v14, %v1166_v13  ;;  %v4222_v13 = vld [vmem:[%s5797_s13 + $0x38] sm:$0xff]  ;;  %v2368_v14 = vld [vmem:[%s5797_s13 + $0x10] sm:$0xff] }
 0x689   :  { %v4616_v16 = vpop.f32.mrf.mxu1  ;;  %v4627_v17 = vpop.f32.mrf.mxu0 }
 0x68a   :  { %v2367_v16 = vld [vmem:[%s5797_s13 + $0x8] sm:$0xff] }
 0x68b   :  { %v1314_v18 = vpop.f32.mrf.mxu1  ;;  %v4220_v17 = vld [vmem:[%s5797_s13 + $0x28] sm:$0xff] }
 0x68c   :  { %4642 = vmatmul.mubr.msk.f32.vlgmr.msra.gmra.mxu0 %vm175_vm1, %v1314_v18  ;;  %v2366_v18 = vld [vmem:[%s5797_s13] sm:$0xff] }
 0x68d   :  { %4661 = vmatpush3.msra.mxu0 %v5172_v51  ;;  %v4632_v19 = vpop.f32.mrf.mxu1  ;;  %4662 = vmatprep.mubr.msk.f32.mxu0 %vm4930_vm2, %v4929_v23 }
 0x68e   :  { %4665 = vmatprep.subr.mxu0 %v4929_v23  ;;  %v4219_v19 = vld [vmem:[%s5797_s13 + $0x20] sm:$0xff] }
 0x68f   :  { %v1468_v21 = vpop.f32.mrf.mxu1 }
 0x690   :  { %4658 = vmatmul.mubr.msk.f32.vlgmr.msra.gmra.mxu1 %vm175_vm1, %v1468_v21  ;;  %4663 = vmatmul.mubr.msk.f32.vlgmr.msra.gmra.mxu0 %vm275_vm3, %v4176_v20  ;;  %v4211_v21 = vld [vmem:[%s5792_s8 + $0x4] ss:$0 sm:$0xff] }
 0x691   :  { %4677 = vmatpush3.msra.mxu1 %v5172_v51  ;;  %4678 = vmatprep.mubr.msk.f32.mxu1 %vm4930_vm2, %v4929_v23  ;;  %v4648_v26 = vpop.f32.mrf.mxu1 }
 0x692   :  { %4666 = vmatpush3.msra.mxu0 %v4181_v22  ;;  %4681 = vmatprep.subr.mxu1 %v4929_v23 }
 0x693   :  { %4667 = vmatprep.subr.mxu0 %v4929_v23  ;;  %4673 = vmatprep.mubr.msk.f32.mxu0 %vm4930_vm2, %v4929_v23 }
 0x694   :  { %4679 = vmatmul.mubr.msk.f32.vlgmr.msra.gmra.mxu1 %vm275_vm3, %v4183_v24  ;;  %4668 = vmatpush3.msra.mxu0 %v4180_v25 }
 0x695   :  { %4669 = vmatprep.subr.mxu0 %v4929_v23  ;;  %4689 = vmatprep.mubr.msk.f32.mxu1 %vm4930_vm2, %v4929_v23 }
 0x696   :  { %4670 = vmatpush3.msra.mxu0 %v4179_v27  ;;  %4682 = vmatpush3.msra.mxu1 %v4188_v28 }
 0x697   :  { %4671 = vmatprep.subr.mxu0 %v4929_v23  ;;  %4683 = vmatprep.subr.mxu1 %v4929_v23 }
 0x698   :  { %4672 = vmatpush3.msra.mxu0 %v4178_v29  ;;  %4684 = vmatpush3.msra.mxu1 %v4187_v30 }
 0x699   :  { %4685 = vmatprep.subr.mxu1 %v4929_v23  ;;  %4692 = vmatprep.subr.mxu0 %v4929_v23 }
 0x69a   :  { %4686 = vmatpush3.msra.mxu1 %v4186_v31 }
 0x69b   :  { %4687 = vmatprep.subr.mxu1 %v4929_v23 }
 0x69c   :  { %4688 = vmatpush3.msra.mxu1 %v4185_v32 }
 0x69d   :  { %4708 = vmatprep.subr.mxu1 %v4929_v23 }
 0x74c   :  { %v1392_v33 = vpop.f32.mrf.mxu0 }
 0x74d   :  { %v1396_v34 = vadd.f32 %v1392_v33, %v1240_v15  ;;  %v4221_v15 = vld [vmem:[%s5797_s13 + $0x30] sm:$0xff] }
 0x74e   :  { %v4643_v35 = vpop.f32.mrf.mxu0 }
 0x750   :  { %v1546_v36 = vpop.f32.mrf.mxu1  ;;  %v1622_v37 = vpop.f32.mrf.mxu0 }
 0x751   :  { %v1550_v38 = vadd.f32 %v1546_v36, %v1396_v34  ;;  %4674 = vmatmul.mubr.msk.f32.vlgmr.msra.gmra.mxu0 %vm175_vm1, %v1622_v37 }
 0x752   :  { %4693 = vmatpush3.msra.mxu0 %v5172_v51  ;;  %v4659_v39 = vpop.f32.mrf.mxu1  ;;  %v4664_v40 = vpop.f32.mrf.mxu0  ;;  %4694 = vmatprep.mubr.msk.f32.mxu0 %vm4930_vm2, %v4929_v23 }
 0x753   :  { %4697 = vmatprep.subr.mxu0 %v4929_v23 }
 0x754   :  { %v1776_v42 = vpop.f32.mrf.mxu1 }
 0x755   :  { %4690 = vmatmul.mubr.msk.f32.vlgmr.msra.gmra.mxu1 %vm175_vm1, %v1776_v42  ;;  %4695 = vmatmul.mubr.msk.f32.vlgmr.msra.gmra.mxu0 %vm275_vm3, %v4190_v41 }
 0x756   :  { %4709 = vmatpush3.msra.mxu1 %v5172_v51  ;;  %4710 = vmatprep.mubr.msk.f32.mxu1 %vm4930_vm2, %v4929_v23  ;;  %v4680_v46 = vpop.f32.mrf.mxu1 }
 0x757   :  { %4698 = vmatpush3.msra.mxu0 %v4195_v43  ;;  %4713 = vmatprep.subr.mxu1 %v4929_v23  ;;  %v4212_v46 = vld [vmem:[%s5792_s8 + $0x5] ss:$0 sm:$0xff] }
 0x758   :  { %4699 = vmatprep.subr.mxu0 %v4929_v23  ;;  %4705 = vmatprep.mubr.msk.f32.mxu0 %vm4930_vm2, %v4929_v23 }
 0x759   :  { %4711 = vmatmul.mubr.msk.f32.vlgmr.msra.gmra.mxu1 %vm275_vm3, %v4197_v44  ;;  %4700 = vmatpush3.msra.mxu0 %v4194_v45 }
 0x75a   :  { %4701 = vmatprep.subr.mxu0 %v4929_v23  ;;  %4721 = vmatprep.mubr.msk.f32.mxu1 %vm4930_vm2, %v4929_v23 }
 0x75b   :  { %4702 = vmatpush3.msra.mxu0 %v4193_v47  ;;  %4714 = vmatpush3.msra.mxu1 %v4202_v48  ;;  %v4213_v48 = vld [vmem:[%s5792_s8 + $0x6] ss:$0 sm:$0xff] }
 0x75c   :  { %4703 = vmatprep.subr.mxu0 %v4929_v23  ;;  %4715 = vmatprep.subr.mxu1 %v4929_v23 }
 0x75d   :  { %4704 = vmatpush3.msra.mxu0 %v4192_v49  ;;  %4716 = vmatpush3.msra.mxu1 %v4201_v50 }
 0x75e   :  { %4724 = vmatprep.subr.mxu0 %v4929_v23  ;;  %4717 = vmatprep.subr.mxu1 %v4929_v23 }
 0x75f   :  { %4718 = vmatpush3.msra.mxu1 %v4200_v52 }
 0x760   :  { %4719 = vmatprep.subr.mxu1 %v4929_v23 }
 0x761   :  { %4720 = vmatpush3.msra.mxu1 %v4199_v53  ;;  %v4215_v53 = vld [vmem:[%s5798_s12 + $0x20] sm:$0xff] }
 0x762   :  { %4740 = vmatprep.subr.mxu1 %v4929_v23 }
 0x811   :  { %v1700_v54 = vpop.f32.mrf.mxu0 }
 0x812   :  { %v1704_v55 = vadd.f32 %v1700_v54, %v1550_v38  ;;  %v2362_v54 = vld [vmem:[%s5798_s12] sm:$0xff] }
 0x813   :  { %v4675_v56 = vpop.f32.mrf.mxu0 }
 0x815   :  { %v1854_v57 = vpop.f32.mrf.mxu1  ;;  %v1930_v58 = vpop.f32.mrf.mxu0 }
 0x816   :  { %v1858_v59 = vadd.f32 %v1854_v57, %v1704_v55  ;;  %4706 = vmatmul.mubr.msk.f32.vlgmr.msra.gmra.mxu0 %vm175_vm1, %v1930_v58  ;;  %v4216_v57 = vld [vmem:[%s5798_s12 + $0x28] sm:$0xff] }
 0x817   :  { %4725 = vmatpush3.msra.mxu0 %v5172_v51  ;;  %v4691_v60 = vpop.f32.mrf.mxu1  ;;  %v4696_v61 = vpop.f32.mrf.mxu0  ;;  %4726 = vmatprep.mubr.msk.f32.mxu0 %vm4930_vm2, %v4929_v23  ;;  %v2363_v58 = vld [vmem:[%s5798_s12 + $0x8] sm:$0xff] }
 0x818   :  { %4729 = vmatprep.subr.mxu0 %v4929_v23  ;;  %v4239_v61 = vld [vmem:[%s5797_s13 + $0x58] sm:$0xff] }
 0x819   :  { %v2084_v0 = vpop.f32.mrf.mxu1 }
 0x81a   :  { %4722 = vmatmul.mubr.msk.f32.vlgmr.msra.gmra.mxu1 %vm175_vm1, %v2084_v0  ;;  %4727 = vmatmul.mubr.msk.f32.vlgmr.msra.gmra.mxu0 %vm275_vm3, %v4204_v62  ;;  %v4252_v62 = vld [vmem:[%s5797_s13 + $0x78] sm:$0xff]  ;;  %v2364_v0 = vld [vmem:[%s5798_s12 + $0x10] sm:$0xff] }
 0x81b   :  { %4730 = vmatpush3.msra.mxu0 %v4209_v63  ;;  %v4712_v51 = vpop.f32.mrf.mxu1  ;;  %4737 = vmatprep.mubr.msk.f32.mxu0 %vm4930_vm2, %v4929_v23  ;;  %v4217_v63 = vld [vmem:[%s5798_s12 + $0x30] sm:$0xff] }
 0x81c   :  { %4731 = vmatprep.subr.mxu0 %v4929_v23  ;;  %4748 = vmatprep.mubr.msk.f32.mxu1 %vm4930_vm2, %v4929_v23  ;;  %v4238_v51 = vld [vmem:[%s5797_s13 + $0x50] sm:$0xff] }
 0x81d   :  { %4732 = vmatpush3.msra.mxu0 %v4208_v1  ;;  %4741 = vmatpush3.msra.mxu1 %v2369_v12  ;;  %v4251_v1 = vld [vmem:[%s5797_s13 + $0x70] sm:$0xff] }
 0x81e   :  { %4733 = vmatprep.subr.mxu0 %v4929_v23  ;;  %4742 = vmatprep.subr.mxu1 %v4929_v23 }
 0x81f   :  { %4734 = vmatpush3.msra.mxu0 %v4207_v2  ;;  %4743 = vmatpush3.msra.mxu1 %v2368_v14  ;;  %v4218_v2 = vld [vmem:[%s5798_s12 + $0x38] sm:$0xff] }
 0x820   :  { %4735 = vmatprep.subr.mxu0 %v4929_v23  ;;  %4744 = vmatprep.subr.mxu1 %v4929_v23 }
 0x821   :  { %4736 = vmatpush3.msra.mxu0 %v4206_v3  ;;  %4745 = vmatpush3.msra.mxu1 %v2367_v16  ;;  %v2365_v3 = vld [vmem:[%s5798_s12 + $0x18] sm:$0xff] }
 0x822   :  { %4751 = vmatprep.subr.mxu0 %v4929_v23  ;;  %4746 = vmatprep.subr.mxu1 %v4929_v23 }
 0x823   :  { %4747 = vmatpush3.msra.mxu1 %v2366_v18 }
 0x8d6   :  { %v2008_v4 = vpop.f32.mrf.mxu0 }
 0x8d7   :  { %v2012_v5 = vadd.f32 %v2008_v4, %v1858_v59  ;;  %v4237_v4 = vld [vmem:[%s5797_s13 + $0x48] sm:$0xff] }
 0x8d8   :  { %v4707_v6 = vpop.f32.mrf.mxu0 }
 0x8d9   :  { %v4236_v6 = vld [vmem:[%s5797_s13 + $0x40] sm:$0xff] }
 0x8da   :  { %v2162_v7 = vpop.f32.mrf.mxu1  ;;  %v2238_v8 = vpop.f32.mrf.mxu0 }
 0x8db   :  { %v2166_v9 = vadd.f32 %v2162_v7, %v2012_v5  ;;  %4738 = vmatmul.mubr.msk.f32.vlgmr.msra.gmra.mxu0 %vm175_vm1, %v2238_v8  ;;  %v4250_v5 = vld [vmem:[%s5797_s13 + $0x68] sm:$0xff]  ;;  %v4249_v7 = vld [vmem:[%s5797_s13 + $0x60] sm:$0xff] }
 0x8dc   :  { %v4728_v10 = vpop.f32.mrf.mxu0  ;;  %v4723_v11 = vpop.f32.mrf.mxu1  ;;  %4759 = vmatprep.mubr.msk.f32.mxu0 %vm4930_vm2, %v4929_v23  ;;  %4752 = vmatpush3.msra.mxu0 %v4222_v13  ;;  %v4232_v8 = vld [vmem:[%s5798_s12 + $0x40] sm:$0xff] }
 0x8dd   :  { %4753 = vmatprep.subr.mxu0 %v4929_v23 }
 0x8de   :  { %4754 = vmatpush3.msra.mxu0 %v4221_v15 }
 0x8df   :  { %4755 = vmatprep.subr.mxu0 %v4929_v23 }
 0x8e0   :  { %4756 = vmatpush3.msra.mxu0 %v4220_v17 }
 0x8e1   :  { %4757 = vmatprep.subr.mxu0 %v4929_v23 }
 0x8e2   :  { %4758 = vmatpush3.msra.mxu0 %v4219_v19 }
 0x99b   :  { %v2316_v20 = vpop.f32.mrf.mxu0 }
 0x99c   :  { %v2320_v22 = vadd.f32 %v2316_v20, %v2166_v9  ;;  %v4245_v9 = vld [vmem:[%s5798_s12 + $0x60] sm:$0xff] }
 0x99d   :  { %v4739_v24 = vpop.f32.mrf.mxu0 }
 0x99e   :  { %v2326_v25 = vadd.f32 %v4211_v21, %v2320_v22 }
 0x9a0   :  { %v2329_v26 = vsel %vm175_vm1, %v2326_v25, 0.0 }
 0x9a1   :  { %v2330_v27 = vrot.slane %v2329_v26, 4 }
 0x9a3   :  { %v2331_v28 = vadd.f32 %v2330_v27, %v2329_v26  ;;  %v4246_v26 = vld [vmem:[%s5798_s12 + $0x68] sm:$0xff] }
 0x9a5   :  { %v2332_v29 = vrot.slane %v2331_v28, 2 }
 0x9a7   :  { %v2333_v30 = vadd.f32 %v2332_v29, %v2331_v28  ;;  %v4234_v29 = vld [vmem:[%s5798_s12 + $0x50] sm:$0xff] }
 0x9a9   :  { %v2334_v31 = vrot.slane %v2333_v30, 1 }
 0x9ab   :  { %v2335_v32 = vadd.f32 %v2334_v31, %v2333_v30  ;;  %v4247_v30 = vld [vmem:[%s5798_s12 + $0x70] sm:$0xff]  ;;  %v4235_v31 = vld [vmem:[%s5798_s12 + $0x58] sm:$0xff] }
 0x9ad   :  { %v2337_v33 = vmul.f32 0.125, %v2335_v32  ;;  %v4248_v32 = vld [vmem:[%s5798_s12 + $0x78] sm:$0xff] }
 0x9af   :  { %v2338_v34 = vsub.f32 %v2326_v25, %v2337_v33  ;;  %v4233_v25 = vld [vmem:[%s5798_s12 + $0x48] sm:$0xff]  ;;  %v3079_v33 = vld [vmem:[%s5799_s14] sm:$0x3] }
 0x9b1   :  { %v2339_v35 = vmul.f32 %v2338_v34, %v2338_v34 }
 0x9b3   :  { %v2340_v36 = vsel %vm175_vm1, %v2339_v35, 0.0  ;;  %v3156_v35 = vld [vmem:[%s5800_s4 + $0x18] sm:$0xff] }
 0x9b4   :  { %v2341_v37 = vrot.slane %v2340_v36, 4 }
 0x9b6   :  { %v2342_v38 = vadd.f32 %v2341_v37, %v2340_v36  ;;  %v3155_v36 = vld [vmem:[%s5800_s4 + $0x10] sm:$0xff]  ;;  %v4264_v37 = vld [vmem:[%s5800_s4 + $0x38] sm:$0xff] }
 0x9b8   :  { %v2343_v39 = vrot.slane %v2342_v38, 2 }
 0x9ba   :  { %v2344_v40 = vadd.f32 %v2343_v39, %v2342_v38  ;;  %v3154_v38 = vld [vmem:[%s5800_s4 + $0x8] sm:$0xff]  ;;  %v4263_v39 = vld [vmem:[%s5800_s4 + $0x30] sm:$0xff] }
 0x9bc   :  { %v2345_v41 = vrot.slane %v2344_v40, 1 }
 0x9be   :  { %v2346_v42 = vadd.f32 %v2345_v41, %v2344_v40  ;;  %v3153_v40 = vld [vmem:[%s5800_s4] sm:$0xff]  ;;  %v4262_v41 = vld [vmem:[%s5800_s4 + $0x28] sm:$0xff] }
 0x9c0   :  { %v2347_v43 = vmul.f32 0.125, %v2346_v42  ;;  %v4261_v42 = vld [vmem:[%s5800_s4 + $0x20] sm:$0xff] }
 0x9c2   :  { %v2348_v44 = vadd.f32 1e-05, %v2347_v43 }
 0x9c4   :  { %4925 = vrsqrt.f32 %v2348_v44 }
 0x9d1   :  { %v4926_v45 = vpop.eup %4925 }
 0x9d2   :  { %v2350_v47 = vmul.f32 %v4926_v45, %v2338_v34  ;;  %v4259_v34 = vld [vmem:[%s5799_s14 + $0x2] sm:$0x3] }
 0x9d4   :  { %v2355_v49 = vmul.f32 %v4212_v46, %v2350_v47 }
 0x9d6   :  { %v2360_v50 = vadd.f32 %v4213_v48, %v2355_v49 }
 0x9d8   :  { %v5458_v52 = vmax.f32 %v2360_v50, 0.0 }
 0x9da   :  { %4749 = vmatmul.mubr.msk.f32.vlgmr.msra.gmra.mxu1 %vm175_vm1, %v5458_v52  ;;  %4760 = vmatmul.mubr.msk.f32.vlgmr.msra.gmra.mxu0 %vm175_vm1, %v5458_v52 }
 0x9db   :  { %4764 = vmatprep.mubr.msk.f32.mxu1 %vm275_vm3, %v4215_v53  ;;  %4772 = vmatprep.mubr.msk.f32.mxu0 %vm275_vm3, %v2362_v54 }
 0xa9a   :  { %v2439_v55 = vpop.f32.mrf.mxu1  ;;  %v2519_v56 = vpop.f32.mrf.mxu0 }
 0xa9b   :  { %4762 = vmatprep.subr.mxu1 %v2519_v56  ;;  %4770 = vmatprep.subr.mxu0 %v2439_v55 }
 0xa9c   :  { %v4750_v59 = vpop.f32.mrf.mxu1  ;;  %v4761_v60 = vpop.f32.mrf.mxu0  ;;  %4763 = vmatpush3.msra.mxu1 %v2519_v56  ;;  %4771 = vmatpush3.msra.mxu0 %v2439_v55 }
 0xa9d   :  { %4765 = vmatmul.mubr.msk.f32.vlgmr.msra.gmra.mxu1 %vm275_vm3, %v4216_v57  ;;  %4773 = vmatmul.mubr.msk.f32.vlgmr.msra.gmra.mxu0 %vm275_vm3, %v2363_v58 }
 0xa9e   :  { %4778 = vmatprep.subr.mxu1 %v4929_v23  ;;  %4797 = vmatprep.subr.mxu0 %v4929_v23 }
 0xa9f   :  { %4779 = vmatpush3.msra.mxu1 %v4239_v61  ;;  %4798 = vmatpush3.msra.mxu0 %v4252_v62  ;;  %v4274_v61 = vld [vmem:[%s5799_s14 + $0x6] sm:$0x3] }
 0xaa0   :  { %4780 = vmatprep.subr.mxu1 %v4929_v23  ;;  %4799 = vmatprep.subr.mxu0 %v4929_v23 }
 0xaa1   :  { %4767 = vmatprep.mubr.msk.f32.mxu1 %vm275_vm3, %v4217_v63  ;;  %4775 = vmatprep.mubr.msk.f32.mxu0 %vm275_vm3, %v2364_v0  ;;  %v4267_v0 = vld [vmem:[%s5799_s14 + $0x4] sm:$0x3] }
 0xaa2   :  { %4781 = vmatpush3.msra.mxu1 %v4238_v51  ;;  %4800 = vmatpush3.msra.mxu0 %v4251_v1  ;;  %v4279_v51 = vld [vmem:[%s5800_s4 + $0x78] sm:$0xff]  ;;  %v4271_v1 = vld [vmem:[%s5800_s4 + $0x50] sm:$0xff] }
 0xaa3   :  { %4768 = vmatmul.mubr.msk.f32.gmra.mxu1 %vm275_vm3, %v4218_v2  ;;  %4776 = vmatmul.mubr.msk.f32.gmra.mxu0 %vm275_vm3, %v2365_v3  ;;  %v4278_v2 = vld [vmem:[%s5800_s4 + $0x70] sm:$0xff]  ;;  %v4270_v3 = vld [vmem:[%s5800_s4 + $0x48] sm:$0xff] }
 0xaa4   :  { %4782 = vmatprep.subr.mxu1 %v4929_v23  ;;  %4801 = vmatprep.subr.mxu0 %v4929_v23 }
 0xaa5   :  { %4783 = vmatpush3.msra.mxu1 %v4237_v4  ;;  %4802 = vmatpush3.msra.mxu0 %v4250_v5  ;;  %v4277_v4 = vld [vmem:[%s5800_s4 + $0x68] sm:$0xff]  ;;  %v4269_v5 = vld [vmem:[%s5800_s4 + $0x40] sm:$0xff] }
 0xaa6   :  { %4784 = vmatprep.subr.mxu1 %v4929_v23  ;;  %4803 = vmatprep.subr.mxu0 %v4929_v23 }
 0xaa7   :  { %4785 = vmatpush3.msra.mxu1 %v4236_v6  ;;  %4786 = vmatprep.mubr.msk.f32.mxu1 %vm4930_vm2, %v4929_v23  ;;  %v4276_v6 = vld [vmem:[%s5800_s4 + $0x60] sm:$0xff] }
 0xaa8   :  { %4804 = vmatpush3.msra.mxu0 %v4249_v7  ;;  %4805 = vmatprep.mubr.msk.f32.mxu0 %vm4930_vm2, %v4929_v23 }
 0xaa9   :  { %4787 = vmatmul.mubr.msk.f32.vlgmr.msra.gmra.mxu1 %vm175_vm1, %v5458_v52  ;;  %4806 = vmatmul.mubr.msk.f32.vlgmr.msra.gmra.mxu0 %vm175_vm1, %v5458_v52 }
 0xaaa   :  { %4791 = vmatprep.mubr.msk.f32.mxu1 %vm275_vm3, %v4232_v8  ;;  %4810 = vmatprep.mubr.msk.f32.mxu0 %vm275_vm3, %v4245_v9 }
 0xb5d   :  { %v4766_v10 = vpop.f32.mrf.mxu1  ;;  %v4774_v11 = vpop.f32.mrf.mxu0 }
 0xb5e   :  { %v5544_v12 = vadd.f32 %v4774_v11, %v4766_v10 }
 0xb5f   :  { %v2601_v13 = vpop.f32.mrf.mxu1  ;;  %v2698_v14 = vpop.f32.mrf.mxu0 }
 0xb60   :  { %v5546_v15 = vadd.f32 %v2698_v14, %v2601_v13 }
 0xb63   :  { %v4769_v16 = vpop.f32.mrf.mxu1  ;;  %v4777_v17 = vpop.f32.mrf.mxu0 }
 0xb64   :  { %v5548_v18 = vadd.f32 %v4777_v17, %v4769_v16 }
 0xb65   :  { %v2611_v19 = vpop.f32.mrf.mxu1  ;;  %v2708_v20 = vpop.f32.mrf.mxu0 }
 0xb66   :  { %v5550_v21 = vadd.f32 %v2708_v20, %v2611_v19 }
 0xb69   :  { %v2793_v22 = vpop.f32.mrf.mxu1  ;;  %v2974_v24 = vpop.f32.mrf.mxu0 }
 0xb6a   :  { %4789 = vmatprep.subr.mxu1 %v2793_v22  ;;  %4808 = vmatprep.subr.mxu0 %v2974_v24 }
 0xb6b   :  { %v4788_v27 = vpop.f32.mrf.mxu1  ;;  %4790 = vmatpush3.msra.mxu1 %v2793_v22  ;;  %v4807_v28 = vpop.f32.mrf.mxu0  ;;  %4809 = vmatpush3.msra.mxu0 %v2974_v24  ;;  %v4281_v22 = vld [vmem:[%s5792_s8 + $0x7] ss:$0 sm:$0xff] }
 0xb6c   :  { %4792 = vmatmul.mubr.msk.f32.vlgmr.msra.gmra.mxu1 %vm275_vm3, %v4233_v25  ;;  %4816 = vmatprep.subr.mxu1 %v4929_v23 }
 0xb6d   :  { %4817 = vmatpush3.msra.mxu1 %v5458_v52  ;;  %4811 = vmatmul.mubr.msk.f32.vlgmr.msra.gmra.mxu0 %vm275_vm3, %v4246_v26 }
 0xb6e   :  { %4794 = vmatprep.mubr.msk.f32.mxu1 %vm275_vm3, %v4234_v29  ;;  %4813 = vmatprep.mubr.msk.f32.mxu0 %vm275_vm3, %v4247_v30 }
 0xb6f   :  { %4821 = vmatprep.subr.mxu1 %v4929_v23  ;;  %4826 = vmatprep.subr.mxu0 %v4929_v23 }
 0xb70   :  { %4795 = vmatmul.mubr.msk.f32.gmra.mxu1 %vm275_vm3, %v4235_v31  ;;  %4827 = vmatpush3.msra.mxu0 %v4264_v37 }
 0xb71   :  { %4814 = vmatmul.mubr.msk.f32.gmra.mxu0 %vm275_vm3, %v4248_v32  ;;  %4818 = vmatprep.mubr.msk.f32.mxu1 %vm4930_vm2, %v4929_v23  ;;  %v3726_v32 = vld [vmem:[%s5801_s5 + $0x18] sm:$0xff] }
 0xb72   :  { %4834 = vmatprep.mubr.msk.f32.mxu0 %vm4930_vm2, %v4929_v23  ;;  %4828 = vmatprep.subr.mxu0 %v4929_v23 }
 0xb73   :  { %4829 = vmatpush3.msra.mxu0 %v4263_v39 }
 0xb74   :  { %4819 = vmatmul.mubr.msk.f32.vlgmr.msra.gmra.mxu1 %vm275_vm3, %v3079_v33  ;;  %4830 = vmatprep.subr.mxu0 %v4929_v23  ;;  %v3725_v33 = vld [vmem:[%s5801_s5 + $0x10] sm:$0xff] }
 0xb75   :  { %4822 = vmatpush3.msra.mxu1 %v5458_v52  ;;  %4823 = vmatprep.mubr.msk.f32.mxu1 %vm4930_vm2, %v4929_v23 }
 0xb76   :  { %4837 = vmatprep.subr.mxu1 %v4929_v23  ;;  %4831 = vmatpush3.msra.mxu0 %v4262_v41  ;;  %v4282_v41 = vld [vmem:[%s5792_s8 + $0x8] ss:$0 sm:$0xff] }
 0xb77   :  { %4832 = vmatprep.subr.mxu0 %v4929_v23 }
 0xb78   :  { %4824 = vmatmul.mubr.msk.f32.vlgmr.msra.gmra.mxu1 %vm275_vm3, %v4259_v34  ;;  %4833 = vmatpush3.msra.mxu0 %v4261_v42  ;;  %v3724_v34 = vld [vmem:[%s5801_s5 + $0x8] sm:$0xff] }
 0xb79   :  { %4845 = vmatprep.mubr.msk.f32.mxu1 %vm4930_vm2, %v4929_v23  ;;  %4838 = vmatpush3.msra.mxu1 %v3156_v35  ;;  %v3723_v35 = vld [vmem:[%s5801_s5] sm:$0xff] }
 0xb7a   :  { %4839 = vmatprep.subr.mxu1 %v4929_v23  ;;  %4848 = vmatprep.subr.mxu0 %v4929_v23 }
 0xb7b   :  { %4840 = vmatpush3.msra.mxu1 %v3155_v36  ;;  %v3915_v36 = vld [vmem:[%s5802_s7] sm:$0xff] }
 0xb7c   :  { %4841 = vmatprep.subr.mxu1 %v4929_v23 }
 0xb7d   :  { %4842 = vmatpush3.msra.mxu1 %v3154_v38 }
 0xb7e   :  { %4843 = vmatprep.subr.mxu1 %v4929_v23 }
 0xb7f   :  { %4844 = vmatpush3.msra.mxu1 %v3153_v40 }
 0xb80   :  { %4864 = vmatprep.subr.mxu1 %v4929_v23 }
 0xc2c   :  { %v4793_v43 = vpop.f32.mrf.mxu1 }
 0xc2d   :  { %v2895_v44 = vadd.f32 %v4793_v43, %v5544_v12  ;;  %v4812_v45 = vpop.f32.mrf.mxu0 }
 0xc2e   :  { %v2875_v46 = vpop.f32.mrf.mxu1 }
 0xc2f   :  { %v2894_v47 = vadd.f32 %v2875_v46, %v5546_v15  ;;  %v5632_v48 = vadd.f32 %v4812_v45, %v2895_v44  ;;  %v3056_v49 = vpop.f32.mrf.mxu0  ;;  %v3805_v46 = vld [vmem:[%s5803_s15] sm:$0xff] }
 0xc30   :  { %v4796_v50 = vpop.f32.mrf.mxu1 }
 0xc31   :  { %v2897_v53 = vadd.f32 %v4796_v50, %v5548_v18  ;;  %v5635_v54 = vadd.f32 %v3056_v49, %v2894_v47  ;;  %v4815_v55 = vpop.f32.mrf.mxu0  ;;  %v4284_v47 = vld [vmem:[%s5792_s8 + $0xa] ss:$0 sm:$0xff] }
 0xc32   :  { %v2885_v56 = vpop.f32.mrf.mxu1 }
 0xc33   :  { %v5638_v57 = vadd.f32 %v2885_v56, %v5550_v21  ;;  %v5640_v58 = vadd.f32 %v4815_v55, %v2897_v53  ;;  %v3066_v8 = vpop.f32.mrf.mxu0  ;;  %v3806_v53 = vld [vmem:[%s5803_s15 + $0x8] sm:$0xff]  ;;  %v3807_v55 = vld [vmem:[%s5803_s15 + $0x10] sm:$0xff] }
 0xc34   :  { %v3149_v59 = vpop.f32.mrf.mxu1  ;;  %v3913_v56 = vld [vmem:[%s5804_s6 + $0x10] sm:$0xff] }
 0xc35   :  { %4846 = vmatmul.mubr.msk.f32.vlgmr.msra.gmra.mxu1 %vm175_vm1, %v3149_v59  ;;  %v3077_v45 = vadd.f32 %v3066_v8, %v5638_v57  ;;  %v3808_v57 = vld [vmem:[%s5803_s15 + $0x18] sm:$0xff]  ;;  %v3911_v59 = vld [vmem:[%s5804_s6] sm:$0xff] }
 0xc36   :  { %4865 = vmatpush3.msra.mxu1 %v5458_v52  ;;  %v4820_v60 = vpop.f32.mrf.mxu1  ;;  %4866 = vmatprep.mubr.msk.f32.mxu1 %vm4930_vm2, %v4929_v23 }
 0xc37   :  { %4869 = vmatprep.subr.mxu1 %v4929_v23 }
 0xc38   :  { %v3228_v62 = vpop.f32.mrf.mxu1 }
 0xc39   :  { %4835 = vmatmul.mubr.msk.f32.vlgmr.msra.gmra.mxu0 %vm175_vm1, %v3228_v62  ;;  %4867 = vmatmul.mubr.msk.f32.vlgmr.msra.gmra.mxu1 %vm275_vm3, %v4274_v61 }
 0xc3a   :  { %4849 = vmatpush3.msra.mxu0 %v5458_v52  ;;  %v4825_v63 = vpop.f32.mrf.mxu1  ;;  %4850 = vmatprep.mubr.msk.f32.mxu0 %vm4930_vm2, %v4929_v23  ;;  %v4272_v52 = vld [vmem:[%s5800_s4 + $0x58] sm:$0xff] }
 0xc3b   :  { %4853 = vmatprep.subr.mxu0 %v4929_v23  ;;  %4877 = vmatprep.mubr.msk.f32.mxu1 %vm4930_vm2, %v4929_v23 }
 0xc3c   :  { %4870 = vmatpush3.msra.mxu1 %v4279_v51 }
 0xc3d   :  { %4851 = vmatmul.mubr.msk.f32.vlgmr.msra.gmra.mxu0 %vm275_vm3, %v4267_v0  ;;  %4871 = vmatprep.subr.mxu1 %v4929_v23 }
 0xc3e   :  { %4861 = vmatprep.mubr.msk.f32.mxu0 %vm4930_vm2, %v4929_v23  ;;  %4854 = vmatpush3.msra.mxu0 %v4272_v52 }
 0xc3f   :  { %4855 = vmatprep.subr.mxu0 %v4929_v23  ;;  %4872 = vmatpush3.msra.mxu1 %v4278_v2 }
 0xc40   :  { %4856 = vmatpush3.msra.mxu0 %v4271_v1  ;;  %4873 = vmatprep.subr.mxu1 %v4929_v23  ;;  %v4299_v1 = vld [vmem:[%s5792_s8 + $0xb] ss:$0 sm:$0xff] }
 0xc41   :  { %4857 = vmatprep.subr.mxu0 %v4929_v23  ;;  %4874 = vmatpush3.msra.mxu1 %v4277_v4 }
 0xc42   :  { %4858 = vmatpush3.msra.mxu0 %v4270_v3  ;;  %4875 = vmatprep.subr.mxu1 %v4929_v23 }
 0xc43   :  { %4859 = vmatprep.subr.mxu0 %v4929_v23  ;;  %4876 = vmatpush3.msra.mxu1 %v4276_v6 }
 0xc44   :  { %4860 = vmatpush3.msra.mxu0 %v4269_v5 }
 0xc45   :  { %4880 = vmatprep.subr.mxu0 %v4929_v23 }
 0xcf5   :  { %v3379_v7 = vpop.f32.mrf.mxu1 }
 0xcf7   :  { %v4847_v9 = vpop.f32.mrf.mxu1 }
 0xcf9   :  { %v3306_v10 = vpop.f32.mrf.mxu0  ;;  %v3608_v11 = vpop.f32.mrf.mxu1 }
 0xcfa   :  { %v3380_v12 = vadd.f32 %v3379_v7, %v3306_v10  ;;  %4878 = vmatmul.mubr.msk.f32.vlgmr.msra.gmra.mxu1 %vm175_vm1, %v3608_v11 }
 0xcfb   :  { %v4836_v13 = vpop.f32.mrf.mxu0  ;;  %v4868_v14 = vpop.f32.mrf.mxu1  ;;  %4893 = vmatprep.mubr.msk.f32.mxu1 %vm3809_vm5, %v3805_v46 }
 0xcfd   :  { %v3454_v15 = vpop.f32.mrf.mxu0 }
 0xcfe   :  { %4862 = vmatmul.mubr.msk.f32.vlgmr.msra.gmra.mxu0 %vm175_vm1, %v3454_v15 }
 0xcff   :  { %v4852_v16 = vpop.f32.mrf.mxu0  ;;  %4888 = vmatprep.mubr.msk.f32.mxu0 %vm4930_vm2, %v4929_v23  ;;  %4881 = vmatpush3.msra.mxu0 %v3726_v32 }
 0xd00   :  { %4882 = vmatprep.subr.mxu0 %v4929_v23 }
 0xd01   :  { %4883 = vmatpush3.msra.mxu0 %v3725_v33 }
 0xd02   :  { %4884 = vmatprep.subr.mxu0 %v4929_v23 }
 0xd03   :  { %4885 = vmatpush3.msra.mxu0 %v3724_v34 }
 0xd04   :  { %4886 = vmatprep.subr.mxu0 %v4929_v23  ;;  %v4283_v23 = vld [vmem:[%s5792_s8 + $0x9] ss:$0 sm:$0xff] }
 0xd05   :  { %4887 = vmatpush3.msra.mxu0 %v3723_v35 }
 0xd06   :  { %4899 = vmatprep.subr.mxu0 %v3915_v36 }
 0xdba   :  { %v3686_v17 = vpop.f32.mrf.mxu1 }
 0xdbc   :  { %v4879_v18 = vpop.f32.mrf.mxu1 }
 0xdbe   :  { %v3532_v19 = vpop.f32.mrf.mxu0 }
 0xdbf   :  { %v3536_v20 = vadd.f32 %v3532_v19, %v3380_v12 }
 0xdc0   :  { %v4863_v21 = vpop.f32.mrf.mxu0 }
 0xdc1   :  { %v3690_v24 = vadd.f32 %v3686_v17, %v3536_v20 }
 0xdc3   :  { %v3696_v25 = vadd.f32 %v4281_v22, %v3690_v24 }
 0xdc5   :  { %v3698_v26 = vsel %vm3697_vm4, %v3696_v25, 0.0 }
 0xdc6   :  { %3699 = vadd.xlane.f32.xlu0 %v3698_v26 }
 0xe4f   :  { %v3700_v27 = vpop.xlane.xlu0 %3699 }
 0xe50   :  { %v3701_v28 = vmul.f32 0.03125, %v3700_v27 }
 0xe52   :  { %v3702_v29 = vsub.f32 %v3696_v25, %v3701_v28 }
 0xe54   :  { %v3703_v30 = vmul.f32 %v3702_v29, %v3702_v29 }
 0xe56   :  { %v3704_v31 = vsel %vm3697_vm4, %v3703_v30, 0.0 }
 0xe57   :  { %3705 = vadd.xlane.f32.xlu0 %v3704_v31 }
 0xee0   :  { %v3706_v37 = vpop.xlane.xlu0 %3705 }
 0xee1   :  { %v3707_v38 = vmul.f32 0.03125, %v3706_v37 }
 0xee3   :  { %v3708_v39 = vadd.f32 1e-05, %v3707_v38 }
 0xee5   :  { %4927 = vrsqrt.f32 %v3708_v39 }
 0xef2   :  { %v4928_v40 = vpop.eup %4927 }
 0xef3   :  { %v3710_v42 = vmul.f32 %v4928_v40, %v3702_v29 }
 0xef5   :  { %v3716_v43 = vmul.f32 %v4282_v41, %v3710_v42 }
 0xef7   :  { %v3722_v44 = vadd.f32 %v4283_v23, %v3716_v43 }
 0xef9   :  { %4889 = vmatmul.mubr.msk.f32.vlgmr.msra.gmra.mxu0 %vm175_vm1, %v3722_v44 }
 0xefa   :  { %4901 = vmatprep.mubr.msk.f32.mxu0 %vm275_vm3, %v5635_v54  ;;  %4900 = vmatpush3.msra.mxu0 %v3915_v36  ;;  %v3914_v54 = vld [vmem:[%s5804_s6 + $0x18] sm:$0xff] }
 0xefd   :  { %4902 = vmatmul.mubr.msk.f32.vlgmr.msra.gmra.mxu0 %vm275_vm3, %v5632_v48 }
 0xefe   :  { %4904 = vmatprep.mubr.msk.f32.mxu0 %vm275_vm3, %v3077_v45 }
 0xf01   :  { %4905 = vmatmul.mubr.msk.f32.gmra.mxu0 %vm275_vm3, %v5640_v58  ;;  %v3912_v58 = vld [vmem:[%s5804_s6 + $0x8] sm:$0xff] }
 0xfb9   :  { %v3801_v49 = vpop.f32.mrf.mxu0 }
 0xfba   :  { %v3802_v50 = vadd.f32 %v4284_v47, %v3801_v49 }
 0xfbb   :  { %v4890_v48 = vpop.f32.mrf.mxu0 }
 0xfbc   :  { %4891 = vmatprep.subr.msk.mxu1 %vm3822_vm6, %v3802_v50 }
 0xfbd   :  { %4892 = vmatpush3.msk.msra.mxu1 %vm3822_vm6, %v3802_v50  ;;  %v4903_v0 = vpop.f32.mrf.mxu0 }
 0xfbe   :  { %4894 = vmatmul.mubr.msk.f32.vlgmr.msra.gmra.mxu1 %vm3809_vm5, %v3806_v53  ;;  %4907 = vmatprep.subr.mxu1 %v3914_v54 }
 0xfbf   :  { %4896 = vmatprep.mubr.msk.f32.mxu1 %vm3809_vm5, %v3807_v55  ;;  %4908 = vmatpush3.msra.mxu1 %v3914_v54  ;;  %v3994_v52 = vpop.f32.mrf.mxu0 }
 0xfc0   :  { %4909 = vmatprep.subr.mxu1 %v3913_v56 }
 0xfc1   :  { %4910 = vmatpush3.msra.mxu1 %v3913_v56  ;;  %v4906_v3 = vpop.f32.mrf.mxu0 }
 0xfc2   :  { %4897 = vmatmul.mubr.msk.f32.gmra.mxu1 %vm3809_vm5, %v3808_v57  ;;  %4911 = vmatprep.subr.mxu1 %v3912_v58 }
 0xfc3   :  { %4912 = vmatpush3.msra.mxu1 %v3912_v58  ;;  %v4004_v10 = vpop.f32.mrf.mxu0 }
 0xfc4   :  { %4913 = vmatprep.subr.mxu1 %v3911_v59 }
 0xfc5   :  { %4914 = vmatpush3.msra.mxu1 %v3911_v59 }
0x107e   :  { %v4895_v60 = vpop.f32.mrf.mxu1 }
0x1080   :  { %v3892_v61 = vpop.f32.mrf.mxu1 }
0x1081   :  { %4915 = vmatprep.mubr.msk.f32.mxu1 %vm175_vm1, %v3892_v61 }
0x1082   :  { %v4898_v62 = vpop.f32.mrf.mxu1  ;;  %4916 = vmatmul.mubr.msk.f32.vlgmr.msra.gmra.mxu1 %vm175_vm1, %v4895_v60 }
0x1084   :  { %v3902_v63 = vpop.f32.mrf.mxu1 }
0x1085   :  { %4918 = vmatprep.mubr.msk.f32.mxu1 %vm175_vm1, %v3902_v63 }
0x1086   :  { %4919 = vmatmul.mubr.msk.f32.gmra.mxu1 %vm175_vm1, %v4898_v62 }
0x1142   :  { %v4917_v51 = vpop.f32.mrf.mxu1 }
0x1143   :  { %v4097_v2 = vadd.f32 %v4917_v51, %v4903_v0 }
0x1144   :  { %v4091_v4 = vpop.f32.mrf.mxu1 }
0x1145   :  { %v4116_v5 = vadd.f32 %v4299_v1, %v4097_v2  ;;  %v4092_v6 = vadd.f32 %v4091_v4, %v3994_v52 }
0x1146   :  { %v4920_v7 = vpop.f32.mrf.mxu1 }
0x1147   :  { %4120 = vst.msk [vmem:[%s5805_s16 + $0x8] sm:$0xff] %vm175_vm1, %v4116_v5  ;;  %v4115_v8 = vadd.f32 %v4299_v1, %v4092_v6  ;;  %v4107_v9 = vadd.f32 %v4920_v7, %v4906_v3 }
0x1148   :  { %v4101_v11 = vpop.f32.mrf.mxu1 }
0x1149   :  { %4119 = vst.msk [vmem:[%s5805_s16] sm:$0xff] %vm175_vm1, %v4115_v8  ;;  %v4118_v12 = vadd.f32 %v4299_v1, %v4107_v9  ;;  %v4102_v13 = vadd.f32 %v4101_v11, %v4004_v10 }
0x114b   :  { %4122 = vst.msk [vmem:[%s5805_s16 + $0x18] sm:$0xff] %vm175_vm1, %v4118_v12  ;;  %v4117_v14 = vadd.f32 %v4299_v1, %v4102_v13 }
0x114d   :  { %4121 = vst.msk [vmem:[%s5805_s16 + $0x10] sm:$0xff] %vm175_vm1, %v4117_v14 }

</bundles_post_ra>
